<compile_context>
chip_gen: v5e
topology: v5e:2x2
jax: 0.10.0
libtpu: 0.0.40
codegen_flags: <defaults>
</compile_context>

<pallas_src>
from functools import partial

import jax
import jax.numpy as jnp
from jax.experimental import pallas as pl
from jax.experimental.pallas import tpu as pltpu

LEAKY_SLOPE = 0.01   # nn.LeakyReLU default
BN_EPS = 1e-5        # nn.BatchNorm1d default
_MAX_TB = 256        # batch rows per grid step: fills the MXU M-dim, fits v7x 64 MiB VMEM

_ACT_DTYPES = {"bfloat16": jnp.bfloat16, "float32": jnp.float32}


def _shift_rows(x, delta):
    """y[:, l, :] = x[:, l+delta, :], zero padded; delta in {-1, +1}. Sublane axis."""
    B, L, C = x.shape
    z = jnp.zeros((B, 1, C), x.dtype)
    if delta == -1:
        return jnp.concatenate([z, x[:, :-1, :]], axis=1)
    return jnp.concatenate([x[:, 1:, :], z], axis=1)


def _maxpool2(h):
    """MaxPool1d(kernel=2, stride=2) along L for channels-last (B, L, C)."""
    B, L, C = h.shape
    return jnp.max(h.reshape(B, L // 2, 2, C), axis=2)


def _conv1d_im2col(h, w_packed):
    """'same' k=3 Conv1d on channels-last h:(B,L,Cin) as ONE fused im2col matmul.

    w_packed: (3*Cin, Cout) bf16 with w_packed[k*Cin + c, o] == torch_w[o, c, k].
    """
    B, L, Cin = h.shape
    cat = jnp.concatenate([_shift_rows(h, -1), h, _shift_rows(h, +1)], axis=-1)
    y = jnp.dot(cat.reshape(B * L, 3 * Cin).astype(jnp.bfloat16), w_packed,
                preferred_element_type=jnp.float32)
    return y.reshape(B, L, w_packed.shape[1])


def _conv_block(h, w_packed, act_dtype):
    """Conv1d(k3,'same') -> MaxPool1d(2) -> Tanh, elementwise math in act_dtype."""
    y = _conv1d_im2col(h, w_packed)
    return jnp.tanh(_maxpool2(y.astype(act_dtype)))


def recommender_kernel(x_ref, p_ref, w2_ref, w3_ref, w4_ref, wout_ref, o_ref, *,
                       act_dtype):
    # Small f32 param pack: rows 0-2 conv1 taps, 3 BN gamma, 4 BN beta, 5 Linear bias.
    p = p_ref[...]                                        # (6, 32)
    w1_0 = p[0:1, :].reshape(1, 1, 32)
    w1_1 = p[1:2, :].reshape(1, 1, 32)
    w1_2 = p[2:3, :].reshape(1, 1, 32)
    gamma = p[3:4, :].reshape(1, 1, 32)
    beta = p[4:5, :].reshape(1, 1, 32)
    b_out = p[5:6, :]                                     # (1, 32)

    # ---- layout switch on the INPUT (TB*32 elements), not on the conv1 output ----
    x = jnp.swapaxes(x_ref[...], 1, 2)                    # (TB, L=32, 1)

    # ---- conv1 (Cin=1): pure VPU broadcast FMAs in channels-last, no MXU ---------
    # h[b, l, o] = w[o,0,0]*x[b,0,l-1] + w[o,0,1]*x[b,0,l] + w[o,0,2]*x[b,0,l+1]
    h = _shift_rows(x, -1) * w1_0 + x * w1_1 + _shift_rows(x, +1) * w1_2  # (TB,32,32)

    # ---- BatchNorm1d(32): training-mode batch stats, folded into one FMA ---------
    # TODO(synk): batch statistics are computed per batch tile; this matches PyTorch
    # .train() exactly only when B <= TB (for eval(), fold running stats into p rows 3/4).
    mean = jnp.mean(h, axis=(0, 1), keepdims=True)                        # (1, 1, 32)
    var = jnp.mean(jnp.square(h - mean), axis=(0, 1), keepdims=True)
    scale = gamma * jax.lax.rsqrt(var + BN_EPS)
    h = h * scale + (beta - mean * scale)

    h = _maxpool2(h)                                      # (TB, 16, 32)
    h = jnp.where(h >= 0, h, LEAKY_SLOPE * h)             # LeakyReLU
    h = h.astype(act_dtype)                               # bf16 on v6e/v7x, f32 on v5e

    # ---- conv2/3/4: fused im2col matmul -> MaxPool(2) -> Tanh --------------------
    h = _conv_block(h, w2_ref[...], act_dtype)            # (TB, 8, 64)
    h = _conv_block(h, w3_ref[...], act_dtype)            # (TB, 4, 128)
    h = _conv_block(h, w4_ref[...], act_dtype)            # (TB, 2, 256)

    # ---- Linear(512,32) as two K=256 dots (no 512-lane concat) + Tanh ------------
    wout = wout_ref[...]                                  # (2, 256, 32) bf16
    y = (jnp.dot(h[:, 0, :].astype(jnp.bfloat16), wout[0],
                 preferred_element_type=jnp.float32)
         + jnp.dot(h[:, 1, :].astype(jnp.bfloat16), wout[1],
                   preferred_element_type=jnp.float32)
         + b_out)
    o_ref[...] = jnp.tanh(y)                              # (TB, 32) f32


def init_params(key):
    """Deterministic synthetic parameters, pre-packed for the kernel's layouts."""
    ks = jax.random.split(key, 6)

    def conv_w(k, cin, cout):
        # Stored as (K=3, Cin, Cout); conv_w[k, c, o] == torch_weight[o, c, k].
        scale = 1.0 / jnp.sqrt(3.0 * cin)
        return jax.random.normal(k, (3, cin, cout), jnp.float32) * scale

    # Coalesced f32 pack (6, 32): conv1 taps / BN gamma / BN beta / Linear bias.
    w1_rows = conv_w(ks[0], 1, 32).reshape(3, 32)
    gamma1 = jnp.ones((1, 32), jnp.float32)
    beta1 = jnp.zeros((1, 32), jnp.float32)
    b_out = jax.random.normal(ks[5], (1, 32), jnp.float32) * 0.01
    p_small = jnp.concatenate([w1_rows, gamma1, beta1, b_out], axis=0)    # (6, 32)

    # conv2/3/4: im2col-packed (3*Cin, Cout) bf16 MXU operands.
    def packed(k, cin, cout):
        return conv_w(k, cin, cout).reshape(3 * cin, cout).astype(jnp.bfloat16)

    w2 = packed(ks[1], 32, 64)
    w3 = packed(ks[2], 64, 128)
    w4 = packed(ks[3], 128, 256)

    # torch Linear weight (32, 512) acts on flatten of NCL (B, C=256, L=2): col=c*2+l.
    # Split per length position: w_out[l, c, o] == w_out_torch[o, c*2 + l].
    w_out_torch = (jax.random.normal(ks[4], (32, 512), jnp.float32)
                   * (1.0 / jnp.sqrt(512.0)))
    w_out = (jnp.transpose(w_out_torch.reshape(32, 256, 2), (2, 1, 0))
             .astype(jnp.bfloat16))                                       # (2, 256, 32)

    return (p_small, w2, w3, w4, w_out)


def _supports_bf16_elementwise():
    """bf16 VPU/EUP exists on v6e/v7x; keep elementwise math in f32 on v5e and older."""
    try:
        kind = jax.devices()[0].device_kind.lower()
    except Exception:
        return False
    if any(t in kind for t in ("v2", "v3", "v4", "v5")):
        return False
    return any(t in kind for t in ("v6", "v7", "trillium"))


def _pick_tb(batch):
    """Largest batch tile <= _MAX_TB that evenly divides the batch."""
    if batch <= _MAX_TB:
        return batch
    tb = _MAX_TB
    while batch % tb:
        tb -= 1
    return tb


@partial(jax.jit, static_argnames=("act_dtype_name",))
def _forward(x_ncl, params, *, act_dtype_name):
    act_dtype = _ACT_DTYPES[act_dtype_name]
    B = x_ncl.shape[0]
    TB = _pick_tb(B)
    p_small, w2, w3, w4, w_out = params

    # Advisory scheduling hint for XLA around the custom call.
    flops = (2 * B * (16 * 96 * 64 + 8 * 192 * 128 + 4 * 384 * 256 + 2 * 256 * 32)
             + 12 * B * 32 * 32)
    transcendentals = B * (8 * 64 + 4 * 128 + 2 * 256 + 32) + 32
    bytes_accessed = (4 * (B * 32 + B * 32 + 6 * 32)
                      + 2 * (96 * 64 + 192 * 128 + 384 * 256 + 2 * 256 * 32))

    return pl.pallas_call(
        partial(recommender_kernel, act_dtype=act_dtype),
        out_shape=jax.ShapeDtypeStruct((B, 32), jnp.float32),
        grid_spec=pltpu.PrefetchScalarGridSpec(
            num_scalar_prefetch=0,
            grid=(B // TB,),
            in_specs=[
                pl.BlockSpec((TB, 1, 32), lambda i: (i, 0, 0)),       # x: tiled over B
                pl.BlockSpec(p_small.shape, lambda i: (0, 0)),        # VMEM-resident
                pl.BlockSpec(w2.shape, lambda i: (0, 0)),
                pl.BlockSpec(w3.shape, lambda i: (0, 0)),
                pl.BlockSpec(w4.shape, lambda i: (0, 0)),
                pl.BlockSpec(w_out.shape, lambda i: (0, 0, 0)),
            ],
            out_specs=pl.BlockSpec((TB, 32), lambda i: (i, 0)),
        ),
        compiler_params=pltpu.CompilerParams(
            dimension_semantics=("parallel",),
            vmem_limit_bytes=48 * 1024 * 1024,
        ),
        cost_estimate=pl.CostEstimate(flops=flops,
                                      transcendentals=transcendentals,
                                      bytes_accessed=bytes_accessed),
    )(x_ncl, p_small, w2, w3, w4, w_out)


def recommender_forward(x_ncl, params):
    """x_ncl: (B, 1, 32) float32, PyTorch NCL layout. Returns (B, 32) float32."""
    name = "bfloat16" if _supports_bf16_elementwise() else "float32"
    return _forward(x_ncl, params, act_dtype_name=name)


if __name__ == "__main__":
    batch_size = 2
    key = jax.random.PRNGKey(0)
    k_x, k_p = jax.random.split(key)

    # PyTorch-style input: (batch, channels=1, length=32)
    x = jax.random.normal(k_x, (batch_size, 1, 32), jnp.float32)
    params = init_params(k_p)

    out = recommender_forward(x, params)
    jax.block_until_ready(out)
    assert out.shape == (batch_size, 32)
    assert bool(jnp.all(jnp.isfinite(out)))
    print("KERNEL_OK")
</pallas_src>

<mosaic_0001>
module attributes {stable_mosaic.version = 11 : i64} {
  func.func @recommender_kernel(%arg0: i32, %arg1: memref<2x1x32xf32, #tpu.memory_space<vmem>>, %arg2: memref<6x32xf32, #tpu.memory_space<vmem>>, %arg3: memref<96x64xbf16, #tpu.memory_space<vmem>>, %arg4: memref<192x128xbf16, #tpu.memory_space<vmem>>, %arg5: memref<384x256xbf16, #tpu.memory_space<vmem>>, %arg6: memref<2x256x32xbf16, #tpu.memory_space<vmem>>, %arg7: memref<2x32xf32, #tpu.memory_space<vmem>>) attributes {dimension_semantics = [#tpu.dimension_semantics<parallel>], iteration_bounds = array<i64: 1>, scalar_prefetch = 0 : i64, scratch_operands = 0 : i64, tpu.core_type = #tpu.core_type<tc>, window_params = [{transform_indices = @transform_0, window_bounds = array<i64: 2, 1, 32>}, {pipeline_mode = #tpu.pipeline_mode<synchronous>, transform_indices = @transform_1, window_bounds = array<i64: 6, 32>}, {pipeline_mode = #tpu.pipeline_mode<synchronous>, transform_indices = @transform_2, window_bounds = array<i64: 96, 64>}, {pipeline_mode = #tpu.pipeline_mode<synchronous>, transform_indices = @transform_3, window_bounds = array<i64: 192, 128>}, {pipeline_mode = #tpu.pipeline_mode<synchronous>, transform_indices = @transform_4, window_bounds = array<i64: 384, 256>}, {pipeline_mode = #tpu.pipeline_mode<synchronous>, transform_indices = @transform_5, window_bounds = array<i64: 2, 256, 32>}, {transform_indices = @transform_6, window_bounds = array<i64: 2, 32>}]} {
    %c0 = arith.constant 0 : index
    %c0_0 = arith.constant 0 : index
    %0 = vector.load %arg2[%c0, %c0_0] : memref<6x32xf32, #tpu.memory_space<vmem>>, vector<6x32xf32>
    %1 = vector.extract_strided_slice %0 {offsets = [0, 0], sizes = [1, 32], strides = [1, 1]} : vector<6x32xf32> to vector<1x32xf32>
    %2 = vector.shape_cast %1 : vector<1x32xf32> to vector<1x1x32xf32>
    %3 = vector.extract_strided_slice %0 {offsets = [1, 0], sizes = [1, 32], strides = [1, 1]} : vector<6x32xf32> to vector<1x32xf32>
    %4 = vector.shape_cast %3 : vector<1x32xf32> to vector<1x1x32xf32>
    %5 = vector.extract_strided_slice %0 {offsets = [2, 0], sizes = [1, 32], strides = [1, 1]} : vector<6x32xf32> to vector<1x32xf32>
    %6 = vector.shape_cast %5 : vector<1x32xf32> to vector<1x1x32xf32>
    %7 = vector.extract_strided_slice %0 {offsets = [3, 0], sizes = [1, 32], strides = [1, 1]} : vector<6x32xf32> to vector<1x32xf32>
    %8 = vector.shape_cast %7 : vector<1x32xf32> to vector<1x1x32xf32>
    %9 = vector.extract_strided_slice %0 {offsets = [4, 0], sizes = [1, 32], strides = [1, 1]} : vector<6x32xf32> to vector<1x32xf32>
    %10 = vector.shape_cast %9 : vector<1x32xf32> to vector<1x1x32xf32>
    %11 = vector.extract_strided_slice %0 {offsets = [5, 0], sizes = [1, 32], strides = [1, 1]} : vector<6x32xf32> to vector<1x32xf32>
    %c0_1 = arith.constant 0 : index
    %c0_2 = arith.constant 0 : index
    %c0_3 = arith.constant 0 : index
    %12 = vector.load %arg1[%c0_1, %c0_2, %c0_3] : memref<2x1x32xf32, #tpu.memory_space<vmem>>, vector<2x1x32xf32>
    %13 = tpu.transpose %12, [0, 2, 1] : vector<2x1x32xf32> -> vector<2x32x1xf32>
    %cst = arith.constant 0.000000e+00 : f32
    %14 = vector.broadcast %cst : f32 to vector<2x1x1xf32>
    %15 = vector.extract_strided_slice %13 {offsets = [0, 0, 0], sizes = [2, 31, 1], strides = [1, 1, 1]} : vector<2x32x1xf32> to vector<2x31x1xf32>
    %16 = tpu.concatenate %14, %15 in 1 : vector<2x1x1xf32>, vector<2x31x1xf32> -> vector<2x32x1xf32>
    %17 = vector.broadcast %16 : vector<2x32x1xf32> to vector<2x32x32xf32>
    %18 = vector.broadcast %2 : vector<1x1x32xf32> to vector<2x32x32xf32>
    %19 = arith.mulf %17, %18 : vector<2x32x32xf32>
    %20 = vector.broadcast %13 : vector<2x32x1xf32> to vector<2x32x32xf32>
    %21 = vector.broadcast %4 : vector<1x1x32xf32> to vector<2x32x32xf32>
    %22 = arith.mulf %20, %21 : vector<2x32x32xf32>
    %23 = arith.addf %19, %22 : vector<2x32x32xf32>
    %cst_4 = arith.constant 0.000000e+00 : f32
    %24 = vector.broadcast %cst_4 : f32 to vector<2x1x1xf32>
    %25 = vector.extract_strided_slice %13 {offsets = [0, 1, 0], sizes = [2, 31, 1], strides = [1, 1, 1]} : vector<2x32x1xf32> to vector<2x31x1xf32>
    %26 = tpu.concatenate %25, %24 in 1 : vector<2x31x1xf32>, vector<2x1x1xf32> -> vector<2x32x1xf32>
    %27 = vector.broadcast %26 : vector<2x32x1xf32> to vector<2x32x32xf32>
    %28 = vector.broadcast %6 : vector<1x1x32xf32> to vector<2x32x32xf32>
    %29 = arith.mulf %27, %28 : vector<2x32x32xf32>
    %30 = arith.addf %23, %29 : vector<2x32x32xf32>
    %cst_5 = arith.constant dense<0.000000e+00> : vector<32xf32>
    %31 = vector.multi_reduction <add>, %30, %cst_5 [0, 1] : vector<2x32x32xf32> to vector<32xf32>
    %32 = vector.shape_cast %31 : vector<32xf32> to vector<1x1x32xf32>
    %cst_6 = arith.constant 6.400000e+01 : f32
    %33 = vector.broadcast %cst_6 : f32 to vector<1x1x32xf32>
    %34 = arith.divf %32, %33 : vector<1x1x32xf32>
    %35 = vector.broadcast %34 : vector<1x1x32xf32> to vector<2x32x32xf32>
    %36 = arith.subf %30, %35 : vector<2x32x32xf32>
    %37 = arith.mulf %36, %36 : vector<2x32x32xf32>
    %cst_7 = arith.constant dense<0.000000e+00> : vector<32xf32>
    %38 = vector.multi_reduction <add>, %37, %cst_7 [0, 1] : vector<2x32x32xf32> to vector<32xf32>
    %39 = vector.shape_cast %38 : vector<32xf32> to vector<1x1x32xf32>
    %cst_8 = arith.constant 6.400000e+01 : f32
    %40 = vector.broadcast %cst_8 : f32 to vector<1x1x32xf32>
    %41 = arith.divf %39, %40 : vector<1x1x32xf32>
    %cst_9 = arith.constant 9.99999974E-6 : f32
    %42 = vector.broadcast %cst_9 : f32 to vector<1x1x32xf32>
    %43 = arith.addf %41, %42 : vector<1x1x32xf32>
    %44 = math.rsqrt %43 : vector<1x1x32xf32>
    %45 = arith.mulf %8, %44 : vector<1x1x32xf32>
    %46 = vector.broadcast %45 : vector<1x1x32xf32> to vector<2x32x32xf32>
    %47 = arith.mulf %30, %46 : vector<2x32x32xf32>
    %48 = arith.mulf %34, %45 : vector<1x1x32xf32>
    %49 = arith.subf %10, %48 : vector<1x1x32xf32>
    %50 = vector.broadcast %49 : vector<1x1x32xf32> to vector<2x32x32xf32>
    %51 = arith.addf %47, %50 : vector<2x32x32xf32>
    %52 = vector.shape_cast %51 : vector<2x32x32xf32> to vector<2x16x2x32xf32>
    %cst_10 = arith.constant dense<0xFF800000> : vector<2x16x32xf32>
    %53 = vector.multi_reduction <maximumf>, %52, %cst_10 [2] : vector<2x16x2x32xf32> to vector<2x16x32xf32>
    %cst_11 = arith.constant 0.000000e+00 : f32
    %54 = vector.broadcast %cst_11 : f32 to vector<2x16x32xf32>
    %55 = arith.cmpf oge, %53, %54 : vector<2x16x32xf32>
    %cst_12 = arith.constant 0.00999999977 : f32
    %56 = vector.broadcast %cst_12 : f32 to vector<2x16x32xf32>
    %57 = arith.mulf %56, %53 : vector<2x16x32xf32>
    %58 = arith.select %55, %53, %57 : vector<2x16x32xi1>, vector<2x16x32xf32>
    %c0_13 = arith.constant 0 : index
    %c0_14 = arith.constant 0 : index
    %59 = vector.load %arg3[%c0_13, %c0_14] : memref<96x64xbf16, #tpu.memory_space<vmem>>, vector<96x64xbf16>
    %cst_15 = arith.constant 0.000000e+00 : f32
    %60 = vector.broadcast %cst_15 : f32 to vector<2x1x32xf32>
    %61 = vector.extract_strided_slice %58 {offsets = [0, 0, 0], sizes = [2, 15, 32], strides = [1, 1, 1]} : vector<2x16x32xf32> to vector<2x15x32xf32>
    %62 = tpu.concatenate %60, %61 in 1 : vector<2x1x32xf32>, vector<2x15x32xf32> -> vector<2x16x32xf32>
    %cst_16 = arith.constant 0.000000e+00 : f32
    %63 = vector.broadcast %cst_16 : f32 to vector<2x1x32xf32>
    %64 = vector.extract_strided_slice %58 {offsets = [0, 1, 0], sizes = [2, 15, 32], strides = [1, 1, 1]} : vector<2x16x32xf32> to vector<2x15x32xf32>
    %65 = tpu.concatenate %64, %63 in 1 : vector<2x15x32xf32>, vector<2x1x32xf32> -> vector<2x16x32xf32>
    %66 = tpu.concatenate %62, %58, %65 in 2 : vector<2x16x32xf32>, vector<2x16x32xf32>, vector<2x16x32xf32> -> vector<2x16x96xf32>
    %67 = vector.shape_cast %66 : vector<2x16x96xf32> to vector<32x96xf32>
    %68 = arith.truncf %67 : vector<32x96xf32> to vector<32x96xbf16>
    %cst_17 = arith.constant dense<0.000000e+00> : vector<32x64xf32>
    %69 = tpu.matmul %68, %59, %cst_17 {dimension_numbers = #tpu.dot_dimension_numbers<[1], [0], [0], [1], [0, 0, 1, 1], [], []>} : vector<32x96xbf16>, vector<96x64xbf16>, vector<32x64xf32> -> vector<32x64xf32>
    %70 = vector.shape_cast %69 : vector<32x64xf32> to vector<2x16x64xf32>
    %71 = vector.shape_cast %70 : vector<2x16x64xf32> to vector<2x8x2x64xf32>
    %cst_18 = arith.constant dense<0xFF800000> : vector<2x8x64xf32>
    %72 = vector.multi_reduction <maximumf>, %71, %cst_18 [2] : vector<2x8x2x64xf32> to vector<2x8x64xf32>
    %73 = math.tanh %72 : vector<2x8x64xf32>
    %c0_19 = arith.constant 0 : index
    %c0_20 = arith.constant 0 : index
    %74 = vector.load %arg4[%c0_19, %c0_20] : memref<192x128xbf16, #tpu.memory_space<vmem>>, vector<192x128xbf16>
    %cst_21 = arith.constant 0.000000e+00 : f32
    %75 = vector.broadcast %cst_21 : f32 to vector<2x1x64xf32>
    %76 = vector.extract_strided_slice %73 {offsets = [0, 0, 0], sizes = [2, 7, 64], strides = [1, 1, 1]} : vector<2x8x64xf32> to vector<2x7x64xf32>
    %77 = tpu.concatenate %75, %76 in 1 : vector<2x1x64xf32>, vector<2x7x64xf32> -> vector<2x8x64xf32>
    %cst_22 = arith.constant 0.000000e+00 : f32
    %78 = vector.broadcast %cst_22 : f32 to vector<2x1x64xf32>
    %79 = vector.extract_strided_slice %73 {offsets = [0, 1, 0], sizes = [2, 7, 64], strides = [1, 1, 1]} : vector<2x8x64xf32> to vector<2x7x64xf32>
    %80 = tpu.concatenate %79, %78 in 1 : vector<2x7x64xf32>, vector<2x1x64xf32> -> vector<2x8x64xf32>
    %81 = tpu.concatenate %77, %73, %80 in 2 : vector<2x8x64xf32>, vector<2x8x64xf32>, vector<2x8x64xf32> -> vector<2x8x192xf32>
    %82 = vector.shape_cast %81 : vector<2x8x192xf32> to vector<16x192xf32>
    %83 = arith.truncf %82 : vector<16x192xf32> to vector<16x192xbf16>
    %cst_23 = arith.constant dense<0.000000e+00> : vector<16x128xf32>
    %84 = tpu.matmul %83, %74, %cst_23 {dimension_numbers = #tpu.dot_dimension_numbers<[1], [0], [0], [1], [0, 0, 1, 1], [], []>} : vector<16x192xbf16>, vector<192x128xbf16>, vector<16x128xf32> -> vector<16x128xf32>
    %85 = vector.shape_cast %84 : vector<16x128xf32> to vector<2x8x128xf32>
    %86 = vector.shape_cast %85 : vector<2x8x128xf32> to vector<2x4x2x128xf32>
    %cst_24 = arith.constant dense<0xFF800000> : vector<2x4x128xf32>
    %87 = vector.multi_reduction <maximumf>, %86, %cst_24 [2] : vector<2x4x2x128xf32> to vector<2x4x128xf32>
    %88 = math.tanh %87 : vector<2x4x128xf32>
    %c0_25 = arith.constant 0 : index
    %c0_26 = arith.constant 0 : index
    %89 = vector.load %arg5[%c0_25, %c0_26] : memref<384x256xbf16, #tpu.memory_space<vmem>>, vector<384x256xbf16>
    %cst_27 = arith.constant 0.000000e+00 : f32
    %90 = vector.broadcast %cst_27 : f32 to vector<2x1x128xf32>
    %91 = vector.extract_strided_slice %88 {offsets = [0, 0, 0], sizes = [2, 3, 128], strides = [1, 1, 1]} : vector<2x4x128xf32> to vector<2x3x128xf32>
    %92 = tpu.concatenate %90, %91 in 1 : vector<2x1x128xf32>, vector<2x3x128xf32> -> vector<2x4x128xf32>
    %cst_28 = arith.constant 0.000000e+00 : f32
    %93 = vector.broadcast %cst_28 : f32 to vector<2x1x128xf32>
    %94 = vector.extract_strided_slice %88 {offsets = [0, 1, 0], sizes = [2, 3, 128], strides = [1, 1, 1]} : vector<2x4x128xf32> to vector<2x3x128xf32>
    %95 = tpu.concatenate %94, %93 in 1 : vector<2x3x128xf32>, vector<2x1x128xf32> -> vector<2x4x128xf32>
    %96 = tpu.concatenate %92, %88, %95 in 2 : vector<2x4x128xf32>, vector<2x4x128xf32>, vector<2x4x128xf32> -> vector<2x4x384xf32>
    %97 = vector.shape_cast %96 : vector<2x4x384xf32> to vector<8x384xf32>
    %98 = arith.truncf %97 : vector<8x384xf32> to vector<8x384xbf16>
    %cst_29 = arith.constant dense<0.000000e+00> : vector<8x256xf32>
    %99 = tpu.matmul %98, %89, %cst_29 {dimension_numbers = #tpu.dot_dimension_numbers<[1], [0], [0], [1], [0, 0, 1, 1], [], []>} : vector<8x384xbf16>, vector<384x256xbf16>, vector<8x256xf32> -> vector<8x256xf32>
    %100 = vector.shape_cast %99 : vector<8x256xf32> to vector<2x4x256xf32>
    %101 = vector.shape_cast %100 : vector<2x4x256xf32> to vector<2x2x2x256xf32>
    %cst_30 = arith.constant dense<0xFF800000> : vector<2x2x256xf32>
    %102 = vector.multi_reduction <maximumf>, %101, %cst_30 [2] : vector<2x2x2x256xf32> to vector<2x2x256xf32>
    %103 = math.tanh %102 : vector<2x2x256xf32>
    %c0_31 = arith.constant 0 : index
    %c0_32 = arith.constant 0 : index
    %c0_33 = arith.constant 0 : index
    %104 = vector.load %arg6[%c0_31, %c0_32, %c0_33] : memref<2x256x32xbf16, #tpu.memory_space<vmem>>, vector<2x256x32xbf16>
    %105 = vector.extract_strided_slice %103 {offsets = [0, 0, 0], sizes = [2, 1, 256], strides = [1, 1, 1]} : vector<2x2x256xf32> to vector<2x1x256xf32>
    %106 = vector.shape_cast %105 : vector<2x1x256xf32> to vector<2x256xf32>
    %107 = arith.truncf %106 : vector<2x256xf32> to vector<2x256xbf16>
    %108 = vector.extract_strided_slice %104 {offsets = [0, 0, 0], sizes = [1, 256, 32], strides = [1, 1, 1]} : vector<2x256x32xbf16> to vector<1x256x32xbf16>
    %109 = vector.shape_cast %108 : vector<1x256x32xbf16> to vector<256x32xbf16>
    %cst_34 = arith.constant dense<0.000000e+00> : vector<2x32xf32>
    %110 = tpu.matmul %107, %109, %cst_34 {dimension_numbers = #tpu.dot_dimension_numbers<[1], [0], [0], [1], [0, 0, 1, 1], [], []>} : vector<2x256xbf16>, vector<256x32xbf16>, vector<2x32xf32> -> vector<2x32xf32>
    %111 = vector.extract_strided_slice %103 {offsets = [0, 1, 0], sizes = [2, 1, 256], strides = [1, 1, 1]} : vector<2x2x256xf32> to vector<2x1x256xf32>
    %112 = vector.shape_cast %111 : vector<2x1x256xf32> to vector<2x256xf32>
    %113 = arith.truncf %112 : vector<2x256xf32> to vector<2x256xbf16>
    %114 = vector.extract_strided_slice %104 {offsets = [1, 0, 0], sizes = [1, 256, 32], strides = [1, 1, 1]} : vector<2x256x32xbf16> to vector<1x256x32xbf16>
    %115 = vector.shape_cast %114 : vector<1x256x32xbf16> to vector<256x32xbf16>
    %cst_35 = arith.constant dense<0.000000e+00> : vector<2x32xf32>
    %116 = tpu.matmul %113, %115, %cst_35 {dimension_numbers = #tpu.dot_dimension_numbers<[1], [0], [0], [1], [0, 0, 1, 1], [], []>} : vector<2x256xbf16>, vector<256x32xbf16>, vector<2x32xf32> -> vector<2x32xf32>
    %117 = arith.addf %110, %116 : vector<2x32xf32>
    %118 = vector.broadcast %11 : vector<1x32xf32> to vector<2x32xf32>
    %119 = arith.addf %117, %118 : vector<2x32xf32>
    %120 = math.tanh %119 : vector<2x32xf32>
    %c0_36 = arith.constant 0 : index
    %c0_37 = arith.constant 0 : index
    %121 = vector.load %arg7[%c0_36, %c0_37] : memref<2x32xf32, #tpu.memory_space<vmem>>, vector<2x32xf32>
    tpu.vector_store %arg7[%c0_36, %c0_37], %120 {strides = array<i32>} : memref<2x32xf32, #tpu.memory_space<vmem>>, vector<2x32xf32>,
    return
  }
  func.func @transform_0(%arg0: i32) -> (i32, i32, i32) {
    %c0_i32 = arith.constant 0 : i32
    %c0_i32_0 = arith.constant 0 : i32
    %c0_i32_1 = arith.constant 0 : i32
    return %arg0, %c0_i32, %c0_i32_0 : i32, i32, i32
  }
  func.func @transform_1(%arg0: i32) -> (i32, i32) {
    %c0_i32 = arith.constant 0 : i32
    %c0_i32_0 = arith.constant 0 : i32
    %c0_i32_1 = arith.constant 0 : i32
    return %c0_i32, %c0_i32_0 : i32, i32
  }
  func.func @transform_2(%arg0: i32) -> (i32, i32) {
    %c0_i32 = arith.constant 0 : i32
    %c0_i32_0 = arith.constant 0 : i32
    %c0_i32_1 = arith.constant 0 : i32
    return %c0_i32, %c0_i32_0 : i32, i32
  }
  func.func @transform_3(%arg0: i32) -> (i32, i32) {
    %c0_i32 = arith.constant 0 : i32
    %c0_i32_0 = arith.constant 0 : i32
    %c0_i32_1 = arith.constant 0 : i32
    return %c0_i32, %c0_i32_0 : i32, i32
  }
  func.func @transform_4(%arg0: i32) -> (i32, i32) {
    %c0_i32 = arith.constant 0 : i32
    %c0_i32_0 = arith.constant 0 : i32
    %c0_i32_1 = arith.constant 0 : i32
    return %c0_i32, %c0_i32_0 : i32, i32
  }
  func.func @transform_5(%arg0: i32) -> (i32, i32, i32) {
    %c0_i32 = arith.constant 0 : i32
    %c0_i32_0 = arith.constant 0 : i32
    %c0_i32_1 = arith.constant 0 : i32
    %c0_i32_2 = arith.constant 0 : i32
    return %c0_i32, %c0_i32_0, %c0_i32_1 : i32, i32, i32
  }
  func.func @transform_6(%arg0: i32) -> (i32, i32) {
    %c0_i32 = arith.constant 0 : i32
    %c0_i32_0 = arith.constant 0 : i32
    return %arg0, %c0_i32 : i32, i32
  }
}

</mosaic_0001>

<bundles_post_ra>
// kernel: _forward.1
= control target key start
LH: loop header
LB: loop body
LE: loop exit
PB: predicated region body
PF: predicated region fallthrough
CT: control target
= control target key end

     0   :  { %11 = vsyncpa [#allocation3], 0  ;;  %s4128_s0 = inlined_call_operand.vmem [shape: f32[2,1,32], index: 0, kind: input, shape index: {}]   ;;  %s4129_s1 = inlined_call_operand.vmem [shape: f32[6,32], index: 1, kind: input, shape index: {}]   ;;  %s4130_s2 = inlined_call_operand.vmem [shape: bf16[96,64], index: 2, kind: input, shape index: {}]   ;;  %s4131_s3 = inlined_call_operand.hbm [shape: bf16[192,128], index: 3, kind: input, shape index: {}]   ;;  %s4132_s4 = inlined_call_operand.vmem [shape: bf16[384,256], index: 4, kind: input, shape index: {}]   ;;  %s4133_s5 = inlined_call_operand.vmem [shape: bf16[2,256,32], index: 5, kind: input, shape index: {}]   ;;  %s4134_s6 = inlined_call_operand.hbm [shape: f32[2,32], index: 6, kind: output, shape index: {}]  }
   0x1   :  { %12 = vsyncpa [#allocation4], 0  ;;  %s23_s23 = sshll.u32 %s4131_s3, 4  ;;  %s2989_s24 = smov [#allocation2]   ;;  %s24_s23 = int_to_ptr.hbm [resolvable:$true] %s23_s23 }
   0x2   :  { %s25_s25 = sshll.u32 %s2989_s24, 4  ;;  %s2990_s26 = smov 64   ;;  %s26_s25 = int_to_ptr.vmem [resolvable:$true] %s25_s25 }
   0x3   :  { %s2991_s27 = smov 4  }
   0x4   :  { %31 = dma.hbm_to_vmem [thread:$0]  %s24_s23, 1536, %s26_s25, [#allocation3], %s2990_s26, %s2990_s26, %s2991_s27  }
   0x5   :  { %2985 = dma.done.wait [#allocation3], 1536  }
   0x6   :  { %2986 = vsyncadd [#allocation3], 4294965760  ;;  %v42_v0 = vld [vmem:[%s4128_s0] sm:$0x1]  ;;  %v2992_v1 = vmov 0   ;;  %vm4136_vm0 = vcmask 1040384  }
   0x7   :  { %44 = vxpose.xlu0.b32.start.end [1/1] (short) (narrow) %v42_v0, 32  ;;  %2838 = vset.pattern.permute.xlu2 %v2992_v1  ;;  %v43_v2 = vld [vmem:[%s4128_s0 + $0x1] sm:$0x1]  ;;  %vm4138_vm1 = vcmask 1046528   ;;  %vm4135_vm2 = vcmask 261120   ;;  %vm4137_vm7 = vcmask 254976  }
   0x8   :  { %2839 = vset.pattern.permute.xlu1 %v2992_v1  ;;  %v3061_v45 = vld [vmem:[%s4129_s1] sm:$0x3f]  ;;  %s2994_s8 = smov 32   ;;  %s2995_s30 = smov [#allocation5]  }
   0x9   :  { %v3064_v46 = vperm.slane %v3061_v45, 1  ;;  %v3067_v47 = vperm.slane %v3061_v45, 0  ;;  %s2325_s0 = sshll.u32 %s2995_s30, 4  ;;  %s2327_s9 = sshll.u32 %s4134_s6, 4  ;;  %s2326_s0 = int_to_ptr.vmem [resolvable:$true] %s2325_s0  ;;  %s2328_s9 = int_to_ptr.hbm [resolvable:$true] %s2327_s9 }
  0x27   :  { %76 = vxpose.xlu0.b32.start.end [1/1] (short) (narrow) %v43_v2, 32 }
  0x8e   :  { %2840 = vset.pattern.permute.xlu0 %v2992_v1 }
  0xab   :  { %v60_v3 = vpop.trf.xlu0 }
  0xac   :  { %179 = vperm.xlu2 %2838, %v60_v3   ;;  %v117_v4 = vrot.slane %v60_v3, 7  ;;  %v228_v11 = vrot.slane %v60_v3, 1 }
  0xae   :  { %v133_v5 = vsel %vm4136_vm0, 0.0, %v117_v4 }
  0xaf   :  { %137 = vperm.xlu1 %2839, %v133_v5   ;;  %v280_v5 = vperm.slane %v3061_v45, 2 }
  0xb3   :  { %v61_v6 = vpop.trf.xlu0 }
  0xb4   :  { %v118_v7 = vrot.slane %v61_v6, 7  ;;  %183 = vperm.xlu2 %2838, %v61_v6   ;;  %v229_v9 = vrot.slane %v61_v6, 1 }
  0xb6   :  { %v119_v8 = vsel %vm4136_vm0, %v117_v4, %v118_v7  ;;  %v230_v12 = vsel %vm4138_vm1, %v228_v11, %v229_v9 }
  0xb7   :  { %141 = vperm.xlu1 %2839, %v119_v8  }
  0xbb   :  { %v62_v10 = vpop.trf.xlu0 }
  0xbc   :  { %187 = vperm.xlu2 %2838, %v62_v10   ;;  %v231_v13 = vrot.slane %v62_v10, 1  ;;  %v120_v14 = vrot.slane %v62_v10, 7 }
  0xbe   :  { %v232_v16 = vsel %vm4138_vm1, %v229_v9, %v231_v13  ;;  %v121_v18 = vsel %vm4136_vm0, %v118_v7, %v120_v14 }
  0xbf   :  { %247 = vperm.xlu1 %2839, %v230_v12  }
  0xc3   :  { %v63_v15 = vpop.trf.xlu0 }
  0xc4   :  { %v233_v17 = vrot.slane %v63_v15, 1  ;;  %251 = vperm.xlu2 %2838, %v232_v16   ;;  %v122_v20 = vrot.slane %v63_v15, 7 }
  0xc6   :  { %v234_v19 = vsel %vm4138_vm1, %v231_v13, %v233_v17  ;;  %v123_v22 = vsel %vm4136_vm0, %v120_v14, %v122_v20  ;;  %v244_v41 = vsel %vm4138_vm1, %v233_v17, 0.0 }
  0xc7   :  { %145 = vperm.xlu1 %2839, %v121_v18   ;;  %255 = vperm.xlu0 %2840, %v234_v19  }
  0xcb   :  { %v92_v21 = vpop.trf.xlu0 }
  0xcc   :  { %191 = vperm.xlu2 %2838, %v63_v15   ;;  %v124_v23 = vrot.slane %v92_v21, 7  ;;  %v235_v28 = vrot.slane %v92_v21, 1 }
  0xce   :  { %v134_v25 = vsel %vm4136_vm0, 0.0, %v124_v23 }
  0xcf   :  { %149 = vperm.xlu1 %2839, %v123_v22  }
  0xd3   :  { %v93_v24 = vpop.trf.xlu0 }
  0xd4   :  { %195 = vperm.xlu2 %2838, %v92_v21   ;;  %v125_v26 = vrot.slane %v93_v24, 7  ;;  %v236_v29 = vrot.slane %v93_v24, 1 }
  0xd6   :  { %v126_v27 = vsel %vm4136_vm0, %v124_v23, %v125_v26  ;;  %v237_v32 = vsel %vm4138_vm1, %v235_v28, %v236_v29 }
  0xd7   :  { %154 = vperm.xlu1 %2839, %v134_v25  }
  0xdb   :  { %v94_v30 = vpop.trf.xlu0 }
  0xdc   :  { %158 = vperm.xlu2 %2838, %v126_v27   ;;  %v127_v31 = vrot.slane %v94_v30, 7  ;;  %v238_v34 = vrot.slane %v94_v30, 1 }
  0xde   :  { %v128_v33 = vsel %vm4136_vm0, %v125_v26, %v127_v31  ;;  %v239_v36 = vsel %vm4138_vm1, %v236_v29, %v238_v34 }
  0xdf   :  { %199 = vperm.xlu1 %2839, %v93_v24  }
  0xe3   :  { %v95_v35 = vpop.trf.xlu0 }
  0xe4   :  { %264 = vperm.xlu2 %2838, %v237_v32   ;;  %v129_v37 = vrot.slane %v95_v35, 7  ;;  %v240_v39 = vrot.slane %v95_v35, 1  ;;  %v2993_v32 = vmov 64.0  }
  0xe5   :  { %2866 = vrcp.f32 %v2993_v32 }
  0xe6   :  { %v130_v38 = vsel %vm4136_vm0, %v127_v31, %v129_v37  ;;  %v241_v40 = vsel %vm4138_vm1, %v238_v34, %v240_v39  ;;  %v245_v42 = vsel %vm4138_vm1, %v240_v39, 0.0 }
  0xe7   :  { %162 = vperm.xlu1 %2839, %v128_v33  }
  0xec   :  { %203 = vperm.xlu2 %2838, %v94_v30  }
  0xef   :  { %268 = vperm.xlu1 %2839, %v239_v36  }
  0xf4   :  { %166 = vperm.xlu2 %2838, %v130_v38  }
  0xf7   :  { %207 = vperm.xlu1 %2839, %v95_v35  }
  0xfc   :  { %272 = vperm.xlu2 %2838, %v241_v40  }
  0xff   :  { %260 = vperm.xlu1 %2839, %v244_v41  }
 0x106   :  { %v180_v43 = vpop.permute.xlu2 %179 }
 0x107   :  { %277 = vperm.xlu1 %2839, %v245_v42   ;;  %v211_v49 = vmul.f32 %v3064_v46, %v180_v43 }
 0x10e   :  { %v184_v44 = vpop.permute.xlu2 %183 }
 0x10f   :  { %v212_v4 = vmul.f32 %v3064_v46, %v184_v44 }
 0x116   :  { %v188_v51 = vpop.permute.xlu2 %187 }
 0x117   :  { %v213_v7 = vmul.f32 %v3064_v46, %v188_v51  ;;  %v2867_v51 = vpop.eup %2866 }
 0x118   :  { %vm324_vm3 = vweird.f32 %v2867_v51 }
 0x11e   :  { %v252_v54 = vpop.permute.xlu2 %251 }
 0x11f   :  { %v282_v11 = vmul.f32 %v280_v5, %v252_v54 }
 0x121   :  { %v138_v48 = vpop.permute.xlu1 %137 }
 0x122   :  { %v170_v50 = vmul.f32 %v3067_v47, %v138_v48 }
 0x124   :  { %v219_v52 = vadd.f32 %v211_v49, %v170_v50 }
 0x126   :  { %v192_v56 = vpop.permute.xlu2 %191 }
 0x127   :  { %v214_v22 = vmul.f32 %v3064_v46, %v192_v56 }
 0x129   :  { %v142_v53 = vpop.permute.xlu1 %141 }
 0x12a   :  { %v171_v3 = vmul.f32 %v3067_v47, %v142_v53 }
 0x12c   :  { %v220_v8 = vadd.f32 %v212_v4, %v171_v3 }
 0x12e   :  { %v196_v58 = vpop.permute.xlu2 %195  ;;  %v3076_v15 = vadd.f32 %v282_v11, %v220_v8 }
 0x12f   :  { %v215_v20 = vmul.f32 %v3064_v46, %v196_v58 }
 0x130   :  { %v299_v23 = vsel %vm4135_vm2, %v3076_v15, 0.0 }
 0x131   :  { %v248_v55 = vpop.permute.xlu1 %247 }
 0x132   :  { %v281_v9 = vmul.f32 %v280_v5, %v248_v55 }
 0x134   :  { %v3078_v17 = vadd.f32 %v281_v9, %v219_v52 }
 0x136   :  { %v159_v61 = vpop.permute.xlu2 %158  ;;  %v298_v24 = vsel %vm4135_vm2, %v3078_v17, 0.0 }
 0x137   :  { %v175_v28 = vmul.f32 %v3067_v47, %v159_v61  ;;  %v300_v37 = vadd.f32 %v299_v23, %v298_v24 }
 0x139   :  { %v146_v57 = vpop.permute.xlu1 %145  ;;  %v256_v10 = vpop.permute.xlu0 %255 }
 0x13a   :  { %v172_v6 = vmul.f32 %v3067_v47, %v146_v57  ;;  %v283_v16 = vmul.f32 %v280_v5, %v256_v10 }
 0x13c   :  { %v221_v12 = vadd.f32 %v213_v7, %v172_v6 }
 0x13e   :  { %v265_v63 = vpop.permute.xlu2 %264  ;;  %v3081_v19 = vadd.f32 %v283_v16, %v221_v12 }
 0x13f   :  { %v285_v30 = vmul.f32 %v280_v5, %v265_v63 }
 0x140   :  { %v301_v29 = vsel %vm4135_vm2, %v3081_v19, 0.0 }
 0x141   :  { %v150_v59 = vpop.permute.xlu1 %149  ;;  %v302_v43 = vadd.f32 %v301_v29, %v300_v37 }
 0x142   :  { %v173_v21 = vmul.f32 %v3067_v47, %v150_v59 }
 0x144   :  { %v222_v33 = vadd.f32 %v214_v22, %v173_v21 }
 0x146   :  { %v204_v1 = vpop.permute.xlu2 %203 }
 0x147   :  { %v217_v34 = vmul.f32 %v3064_v46, %v204_v1 }
 0x149   :  { %v155_v60 = vpop.permute.xlu1 %154 }
 0x14a   :  { %v174_v18 = vmul.f32 %v3067_v47, %v155_v60  ;;  %v320_v60 = vmul.f32 64.0, %v2867_v51 }
 0x14c   :  { %v223_v25 = vadd.f32 %v215_v20, %v174_v18  ;;  %v321_v1 = vsub.f32 1.0, %v320_v60 }
 0x14e   :  { %v167_v13 = vpop.permute.xlu2 %166  ;;  %v3096_v39 = vadd.f32 %v285_v30, %v223_v25  ;;  %v322_v4 = vmul.f32 %v2867_v51, %v321_v1 }
 0x14f   :  { %v177_v54 = vmul.f32 %v3067_v47, %v167_v13 }
 0x150   :  { %v305_v53 = vsel %vm4135_vm2, %v3096_v39, 0.0  ;;  %v323_v8 = vadd.f32 %v2867_v51, %v322_v4 }
 0x151   :  { %v200_v62 = vpop.permute.xlu1 %199 }
 0x152   :  { %v216_v26 = vmul.f32 %v3064_v46, %v200_v62  ;;  %v325_v10 = vsel %vm324_vm3, %v2867_v51, %v323_v8 }
 0x154   :  { %v224_v40 = vadd.f32 %v216_v26, %v175_v28 }
 0x156   :  { %v273_v38 = vpop.permute.xlu2 %272 }
 0x157   :  { %v287_v44 = vmul.f32 %v280_v5, %v273_v38 }
 0x159   :  { %v163_v0 = vpop.permute.xlu1 %162 }
 0x15a   :  { %v176_v27 = vmul.f32 %v3067_v47, %v163_v0 }
 0x15c   :  { %v225_v41 = vadd.f32 %v217_v34, %v176_v27 }
 0x15e   :  { %v3108_v55 = vadd.f32 %v287_v44, %v225_v41 }
 0x160   :  { %v309_v62 = vsel %vm4135_vm2, %v3108_v55, 0.0 }
 0x161   :  { %v269_v2 = vpop.permute.xlu1 %268 }
 0x162   :  { %v286_v35 = vmul.f32 %v280_v5, %v269_v2 }
 0x164   :  { %v3100_v48 = vadd.f32 %v286_v35, %v224_v40 }
 0x166   :  { %v307_v58 = vsel %vm4135_vm2, %v3100_v48, 0.0 }
 0x169   :  { %v208_v14 = vpop.permute.xlu1 %207 }
 0x16a   :  { %v218_v49 = vmul.f32 %v3064_v46, %v208_v14 }
 0x16c   :  { %v226_v59 = vadd.f32 %v218_v49, %v177_v54 }
 0x171   :  { %v261_v31 = vpop.permute.xlu1 %260 }
 0x172   :  { %v284_v36 = vmul.f32 %v280_v5, %v261_v31 }
 0x174   :  { %v3098_v42 = vadd.f32 %v284_v36, %v222_v33 }
 0x176   :  { %v303_v50 = vsel %vm4135_vm2, %v3098_v42, 0.0 }
 0x177   :  { %v304_v52 = vadd.f32 %v303_v50, %v302_v43 }
 0x179   :  { %v306_v56 = vadd.f32 %v305_v53, %v304_v52  ;;  %v278_v57 = vpop.permute.xlu1 %277 }
 0x17a   :  { %v288_v46 = vmul.f32 %v280_v5, %v278_v57 }
 0x17b   :  { %v308_v61 = vadd.f32 %v307_v58, %v306_v56 }
 0x17c   :  { %v3114_v63 = vadd.f32 %v288_v46, %v226_v59 }
 0x17d   :  { %v310_v0 = vadd.f32 %v309_v62, %v308_v61 }
 0x17e   :  { %v311_v47 = vsel %vm4135_vm2, %v3114_v63, 0.0 }
 0x17f   :  { %v312_v2 = vadd.f32 %v311_v47, %v310_v0 }
 0x181   :  { %v313_v3 = vrot.slane %v312_v2, 4 }
 0x183   :  { %v314_v6 = vadd.f32 %v313_v3, %v312_v2 }
 0x185   :  { %v315_v7 = vrot.slane %v314_v6, 2 }
 0x187   :  { %v316_v9 = vadd.f32 %v315_v7, %v314_v6 }
 0x189   :  { %v317_v5 = vrot.slane %v316_v9, 1 }
 0x18b   :  { %v318_v11 = vadd.f32 %v317_v5, %v316_v9 }
 0x18d   :  { %v326_v12 = vmul.f32 %v325_v10, %v318_v11 }
 0x18f   :  { %v327_v13 = vsub.f32 %v3078_v17, %v326_v12  ;;  %v328_v14 = vsub.f32 %v3076_v15, %v326_v12  ;;  %v329_v16 = vsub.f32 %v3081_v19, %v326_v12  ;;  %v330_v18 = vsub.f32 %v3098_v42, %v326_v12 }
 0x190   :  { %v331_v20 = vsub.f32 %v3096_v39, %v326_v12  ;;  %v332_v24 = vsub.f32 %v3100_v48, %v326_v12  ;;  %v333_v29 = vsub.f32 %v3108_v55, %v326_v12  ;;  %v334_v33 = vsub.f32 %v3114_v63, %v326_v12 }
 0x191   :  { %v335_v21 = vmul.f32 %v327_v13, %v327_v13  ;;  %v336_v22 = vmul.f32 %v328_v14, %v328_v14  ;;  %v337_v23 = vmul.f32 %v329_v16, %v329_v16  ;;  %v338_v25 = vmul.f32 %v330_v18, %v330_v18 }
 0x192   :  { %v339_v30 = vmul.f32 %v331_v20, %v331_v20  ;;  %v340_v34 = vmul.f32 %v332_v24, %v332_v24  ;;  %v341_v37 = vmul.f32 %v333_v29, %v333_v29  ;;  %v342_v41 = vmul.f32 %v334_v33, %v334_v33 }
 0x193   :  { %v343_v26 = vsel %vm4135_vm2, %v335_v21, 0.0  ;;  %v344_v27 = vsel %vm4135_vm2, %v336_v22, 0.0  ;;  %v346_v31 = vsel %vm4135_vm2, %v337_v23, 0.0  ;;  %v348_v35 = vsel %vm4135_vm2, %v338_v25, 0.0 }
 0x194   :  { %v345_v28 = vadd.f32 %v344_v27, %v343_v26  ;;  %v350_v38 = vsel %vm4135_vm2, %v339_v30, 0.0  ;;  %v352_v43 = vsel %vm4135_vm2, %v340_v34, 0.0  ;;  %v354_v49 = vsel %vm4135_vm2, %v341_v37, 0.0 }
 0x195   :  { %v356_v51 = vsel %vm4135_vm2, %v342_v41, 0.0 }
 0x196   :  { %v347_v32 = vadd.f32 %v346_v31, %v345_v28 }
 0x198   :  { %v349_v36 = vadd.f32 %v348_v35, %v347_v32 }
 0x19a   :  { %v351_v40 = vadd.f32 %v350_v38, %v349_v36 }
 0x19c   :  { %v353_v44 = vadd.f32 %v352_v43, %v351_v40 }
 0x19e   :  { %v355_v50 = vadd.f32 %v354_v49, %v353_v44 }
 0x1a0   :  { %v357_v52 = vadd.f32 %v356_v51, %v355_v50 }
 0x1a2   :  { %v358_v53 = vrot.slane %v357_v52, 4 }
 0x1a4   :  { %v359_v54 = vadd.f32 %v358_v53, %v357_v52 }
 0x1a6   :  { %v360_v56 = vrot.slane %v359_v54, 2 }
 0x1a8   :  { %v361_v57 = vadd.f32 %v360_v56, %v359_v54 }
 0x1aa   :  { %v362_v58 = vrot.slane %v361_v57, 1 }
 0x1ac   :  { %v363_v59 = vadd.f32 %v362_v58, %v361_v57 }
 0x1ae   :  { %v364_v60 = vmul.f32 %v363_v59, %v325_v10 }
 0x1b0   :  { %v365_v46 = vadd.f32 1e-05, %v364_v60 }
 0x1b2   :  { %2868 = vrsqrt.f32 %v365_v46  ;;  %vm372_vm5 = vweird.f32 %v365_v46 }
 0x1b8   :  { %v2869_v61 = vpop.eup %2868 }
 0x1b9   :  { %v367_v62 = vmul.f32 %v2869_v61, %v365_v46  ;;  %vm373_vm4 = vweird.f32 %v2869_v61 }
 0x1ba   :  { %vm374_vm6 = vmor %vm372_vm5, %vm373_vm4 }
 0x1bb   :  { %v368_v0 = vmul.f32 %v2869_v61, %v367_v62 }
 0x1bd   :  { %v369_v1 = vmul.f32 0.5, %v368_v0 }
 0x1bf   :  { %v370_v47 = vsub.f32 1.5, %v369_v1 }
 0x1c1   :  { %v371_v2 = vmul.f32 %v2869_v61, %v370_v47 }
 0x1c3   :  { %v375_v3 = vsel %vm374_vm6, %v2869_v61, %v371_v2 }
 0x1c4   :  { %v376_v4 = vmul.f32 %v375_v3, %v3061_v45 }
 0x1c6   :  { %v386_v6 = vmul.f32 %v376_v4, %v326_v12  ;;  %v377_v7 = vperm.slane %v376_v4, 3 }
 0x1c8   :  { %v388_v8 = vrot.slane %v386_v6, 7  ;;  %v385_v5 = vmul.f32 %v377_v7, %v3114_v63  ;;  %v378_v11 = vmul.f32 %v377_v7, %v3078_v17  ;;  %v379_v13 = vmul.f32 %v377_v7, %v3076_v15 }
 0x1c9   :  { %v380_v14 = vmul.f32 %v377_v7, %v3081_v19  ;;  %v381_v16 = vmul.f32 %v377_v7, %v3098_v42  ;;  %v382_v18 = vmul.f32 %v377_v7, %v3096_v39  ;;  %v383_v12 = vmul.f32 %v377_v7, %v3100_v48 }
 0x1ca   :  { %v390_v9 = vsub.f32 %v3061_v45, %v388_v8  ;;  %v384_v22 = vmul.f32 %v377_v7, %v3108_v55 }
 0x1cc   :  { %v391_v10 = vperm.slane %v390_v9, 4 }
 0x1ce   :  { %v3143_v20 = vadd.f32 %v391_v10, %v385_v5  ;;  %v392_v21 = vadd.f32 %v391_v10, %v378_v11  ;;  %v393_v45 = vadd.f32 %v391_v10, %v379_v13  ;;  %v3146_v63 = vadd.f32 %v391_v10, %v380_v14 }
 0x1cf   :  { %v3148_v23 = vadd.f32 %v391_v10, %v381_v16  ;;  %v3150_v17 = vadd.f32 %v391_v10, %v382_v18  ;;  %v3155_v39 = vadd.f32 %v391_v10, %v383_v12  ;;  %v3157_v42 = vadd.f32 %v391_v10, %v384_v22 }
 0x1d0   :  { %v429_v15 = vrot.slane %v3143_v20, 2  ;;  %v653_v19 = vsel %vm4137_vm7, %v3143_v20, -inf  ;;  %v430_v48 = vrot.slane %v3143_v20, 4  ;;  %v431_v24 = vrot.slane %v3143_v20, 6 }
 0x1d1   :  { %v654_v55 = vrot.slane %v653_v19, 4  ;;  %v408_v25 = vrot.slane %v392_v21, 2  ;;  %v409_v27 = vrot.slane %v392_v21, 4  ;;  %v410_v28 = vrot.slane %v392_v21, 6 }
 0x1d2   :  { %v3162_v26 = vsel %vm4137_vm7, %v429_v15, -inf  ;;  %v411_v29 = vrot.slane %v393_v45, 2  ;;  %v412_v32 = vrot.slane %v393_v45, 4  ;;  %v413_v33 = vrot.slane %v393_v45, 6 }
 0x1d3   :  { %v3164_v30 = vmax.f32 %v653_v19, %v654_v55  ;;  %v661_v31 = vrot.slane %v3162_v26, 4  ;;  %v414_v34 = vrot.slane %v3146_v63, 2  ;;  %v415_v35 = vrot.slane %v3146_v63, 4 }
 0x1d4   :  { %v416_v36 = vrot.slane %v3146_v63, 6  ;;  %v417_v37 = vrot.slane %v3148_v23, 2  ;;  %v418_v38 = vrot.slane %v3148_v23, 4  ;;  %v419_v40 = vrot.slane %v3148_v23, 6 }
 0x1d5   :  { %v457_v41 = vsel %vm4137_vm7, %v392_v21, -inf  ;;  %v464_v43 = vsel %vm4137_vm7, %v408_v25, -inf  ;;  %v471_v50 = vsel %vm4137_vm7, %v409_v27, -inf  ;;  %v478_v51 = vsel %vm4137_vm7, %v410_v28, -inf }
 0x1d6   :  { %v458_v44 = vrot.slane %v457_v41, 4  ;;  %v465_v49 = vrot.slane %v464_v43, 4  ;;  %v656_v52 = vrot.slane %v3164_v30, 2  ;;  %v472_v53 = vrot.slane %v471_v50, 4 }
 0x1d7   :  { %v479_v54 = vrot.slane %v478_v51, 4  ;;  %v485_v56 = vsel %vm4137_vm7, %v393_v45, -inf  ;;  %v492_v60 = vsel %vm4137_vm7, %v411_v29, -inf  ;;  %v499_v0 = vsel %vm4137_vm7, %v412_v32, -inf }
 0x1d8   :  { %v459_v57 = vmax.f32 %v457_v41, %v458_v44  ;;  %v466_v58 = vmax.f32 %v464_v43, %v465_v49  ;;  %v486_v59 = vrot.slane %v485_v56, 4  ;;  %v473_v46 = vmax.f32 %v471_v50, %v472_v53 }
 0x1d9   :  { %v480_v61 = vmax.f32 %v478_v51, %v479_v54  ;;  %v493_v62 = vrot.slane %v492_v60, 4  ;;  %v500_v3 = vrot.slane %v499_v0, 4  ;;  %v506_v8 = vsel %vm4137_vm7, %v413_v33, -inf }
 0x1da   :  { %v460_v1 = vrot.slane %v459_v57, 2  ;;  %v467_v47 = vrot.slane %v466_v58, 2  ;;  %v487_v2 = vmax.f32 %v485_v56, %v486_v59  ;;  %v474_v4 = vrot.slane %v473_v46, 2 }
 0x1db   :  { %v481_v6 = vrot.slane %v480_v61, 2  ;;  %v494_v7 = vmax.f32 %v492_v60, %v493_v62  ;;  %v501_v11 = vmax.f32 %v499_v0, %v500_v3  ;;  %v507_v18 = vrot.slane %v506_v8, 4 }
 0x1dc   :  { %v461_v9 = vmax.f32 %v459_v57, %v460_v1  ;;  %v468_v5 = vmax.f32 %v466_v58, %v467_v47  ;;  %v488_v10 = vrot.slane %v487_v2, 2  ;;  %v475_v13 = vmax.f32 %v473_v46, %v474_v4 }
 0x1dd   :  { %v482_v14 = vmax.f32 %v480_v61, %v481_v6  ;;  %v495_v16 = vrot.slane %v494_v7, 2  ;;  %v502_v22 = vrot.slane %v501_v11, 2  ;;  %v508_v25 = vmax.f32 %v506_v8, %v507_v18 }
 0x1de   :  { %v462_v12 = vrot.slane %v461_v9, 1  ;;  %v469_v21 = vrot.slane %v468_v5, 1  ;;  %v489_v45 = vmax.f32 %v487_v2, %v488_v10  ;;  %v476_v15 = vrot.slane %v475_v13, 1 }
 0x1df   :  { %v483_v19 = vrot.slane %v482_v14, 1  ;;  %v496_v55 = vmax.f32 %v494_v7, %v495_v16  ;;  %v503_v32 = vmax.f32 %v501_v11, %v502_v22  ;;  %v509_v44 = vrot.slane %v508_v25, 2 }
 0x1e0   :  { %v3182_v27 = vmax.f32 %v461_v9, %v462_v12  ;;  %v3184_v28 = vmax.f32 %v468_v5, %v469_v21  ;;  %v490_v29 = vrot.slane %v489_v45, 1  ;;  %v3186_v33 = vmax.f32 %v475_v13, %v476_v15 }
 0x1e1   :  { %v3188_v41 = vmax.f32 %v482_v14, %v483_v19  ;;  %v497_v43 = vrot.slane %v496_v55, 1  ;;  %v504_v50 = vrot.slane %v503_v32, 1  ;;  %v513_v51 = vsel %vm4137_vm7, %v3146_v63, -inf }
 0x1e2   :  { %v3190_v49 = vmax.f32 %v489_v45, %v490_v29  ;;  %v520_v53 = vsel %vm4137_vm7, %v414_v34, -inf  ;;  %v510_v56 = vmax.f32 %v508_v25, %v509_v44  ;;  %v514_v57 = vrot.slane %v513_v51, 4 }
 0x1e3   :  { %v3195_v54 = vmax.f32 %v496_v55, %v497_v43  ;;  %v521_v58 = vrot.slane %v520_v53, 4  ;;  %v3197_v59 = vmax.f32 %v503_v32, %v504_v50  ;;  %v527_v60 = vsel %vm4137_vm7, %v415_v35, -inf }
 0x1e4   :  { %v534_v46 = vsel %vm4137_vm7, %v416_v36, -inf  ;;  %v541_v61 = vsel %vm4137_vm7, %v3148_v23, -inf  ;;  %v511_v62 = vrot.slane %v510_v56, 1  ;;  %v515_v34 = vmax.f32 %v513_v51, %v514_v57 }
 0x1e5   :  { %v522_v0 = vmax.f32 %v520_v53, %v521_v58  ;;  %v528_v1 = vrot.slane %v527_v60, 4  ;;  %v535_v47 = vrot.slane %v534_v46, 4  ;;  %v542_v2 = vrot.slane %v541_v61, 4 }
 0x1e6   :  { %v548_v3 = vsel %vm4137_vm7, %v417_v37, -inf  ;;  %v555_v35 = vsel %vm4137_vm7, %v418_v38, -inf  ;;  %v3213_v63 = vmax.f32 %v510_v56, %v511_v62  ;;  %v516_v36 = vrot.slane %v515_v34, 2 }
 0x1e7   :  { %v523_v4 = vrot.slane %v522_v0, 2  ;;  %v529_v6 = vmax.f32 %v527_v60, %v528_v1  ;;  %v536_v7 = vmax.f32 %v534_v46, %v535_v47  ;;  %v543_v8 = vmax.f32 %v541_v61, %v542_v2 }
 0x1e8   :  { %v549_v9 = vrot.slane %v548_v3, 4  ;;  %v556_v5 = vrot.slane %v555_v35, 4  ;;  %v517_v10 = vmax.f32 %v515_v34, %v516_v36  ;;  %v562_v37 = vsel %vm4137_vm7, %v419_v40, -inf }
 0x1e9   :  { %v524_v11 = vmax.f32 %v522_v0, %v523_v4  ;;  %v530_v13 = vrot.slane %v529_v6, 2  ;;  %v537_v14 = vrot.slane %v536_v7, 2  ;;  %v544_v16 = vrot.slane %v543_v8, 2 }
 0x1ea   :  { %v550_v18 = vmax.f32 %v548_v3, %v549_v9  ;;  %v557_v38 = vmax.f32 %v555_v35, %v556_v5  ;;  %v518_v12 = vrot.slane %v517_v10, 1  ;;  %v563_v22 = vrot.slane %v562_v37, 4 }
 0x1eb   :  { %v525_v21 = vrot.slane %v524_v11, 1  ;;  %v531_v45 = vmax.f32 %v529_v6, %v530_v13  ;;  %v538_v15 = vmax.f32 %v536_v7, %v537_v14  ;;  %v545_v19 = vmax.f32 %v543_v8, %v544_v16 }
 0x1ec   :  { %v551_v55 = vrot.slane %v550_v18, 2  ;;  %v558_v25 = vrot.slane %v557_v38, 2  ;;  %v519_v29 = vmax.f32 %v517_v10, %v518_v12  ;;  %v564_v44 = vmax.f32 %v562_v37, %v563_v22 }
 0x1ed   :  { %v526_v32 = vmax.f32 %v524_v11, %v525_v21  ;;  %v532_v43 = vrot.slane %v531_v45, 1  ;;  %v539_v50 = vrot.slane %v538_v15, 1  ;;  %v546_v23 = vrot.slane %v545_v19, 1 }
 0x1ee   :  { %v552_v51 = vmax.f32 %v550_v18, %v551_v55  ;;  %v559_v40 = vmax.f32 %v557_v38, %v558_v25  ;;  %v565_v56 = vrot.slane %v564_v44, 2  ;;  %vm681_vm8 = vcmp.ge.f32.partialorder %v3182_v27, 0.0 }
 0x1ef   :  { %v533_v53 = vmax.f32 %v531_v45, %v532_v43  ;;  %vm682_vm9 = vcmp.ge.f32.partialorder %v3184_v28, 0.0  ;;  %v540_v57 = vmax.f32 %v538_v15, %v539_v50  ;;  %v547_v58 = vmax.f32 %v545_v19, %v546_v23 }
 0x1f0   :  { %v553_v60 = vrot.slane %v552_v51, 1  ;;  %v560_v46 = vrot.slane %v559_v40, 1  ;;  %v566_v61 = vmax.f32 %v564_v44, %v565_v56  ;;  %vm683_vm10 = vcmp.ge.f32.partialorder %v3186_v33, 0.0 }
 0x1f1   :  { %vm684_vm11 = vcmp.ge.f32.partialorder %v3188_v41, 0.0  ;;  %vm685_vm12 = vcmp.ge.f32.partialorder %v3190_v49, 0.0  ;;  %vm686_vm13 = vcmp.ge.f32.partialorder %v3195_v54, 0.0  ;;  %vm687_vm14 = vcmp.ge.f32.partialorder %v3197_v59, 0.0 }
 0x1f2   :  { %v554_v62 = vmax.f32 %v552_v51, %v553_v60  ;;  %v561_v34 = vmax.f32 %v559_v40, %v560_v46  ;;  %v567_v0 = vrot.slane %v566_v61, 1  ;;  %vm688_vm15 = vcmp.ge.f32.partialorder %v3213_v63, 0.0 }
 0x1f3   :  { %vm689_vm3 = vcmp.ge.f32.partialorder %v519_v29, 0.0  ;;  %vm690_vm4 = vcmp.ge.f32.partialorder %v526_v32, 0.0  ;;  %vm691_vm5 = vcmp.ge.f32.partialorder %v533_v53, 0.0  ;;  %vm692_vm6 = vcmp.ge.f32.partialorder %v540_v57, 0.0 }
 0x1f4   :  { %vm693_vm2 = vcmp.ge.f32.partialorder %v547_v58, 0.0  ;;  %vm694_vm0 = vcmp.ge.f32.partialorder %v554_v62, 0.0  ;;  %v568_v1 = vmax.f32 %v566_v61, %v567_v0  ;;  %vm695_vm7 = vcmp.ge.f32.partialorder %v561_v34, 0.0 }
 0x1f5   :  { %v713_v47 = vmul.f32 0.01, %v3182_v27  ;;  %v714_v2 = vmul.f32 0.01, %v3184_v28  ;;  %v3231_v3 = vmax.f32 %v3162_v26, %v661_v31  ;;  %v715_v35 = vmul.f32 0.01, %v3186_v33 }
 0x1f6   :  { %v716_v36 = vmul.f32 0.01, %v3188_v41  ;;  %v717_v4 = vmul.f32 0.01, %v3190_v49  ;;  %vm696_vm1 = vcmp.ge.f32.partialorder %v568_v1, 0.0  ;;  %v420_v15 = vrot.slane %v3150_v17, 2 }
 0x1f7   :  { %v718_v6 = vmul.f32 0.01, %v3195_v54  ;;  %v719_v7 = vmul.f32 0.01, %v3197_v59  ;;  %v3241_v8 = vsel %vm681_vm8, %v3182_v27, %v713_v47  ;;  %v720_v9 = vmul.f32 0.01, %v3213_v63 }
 0x1f8   :  { %v721_v26 = vmul.f32 0.01, %v519_v29  ;;  %v722_v31 = vmul.f32 0.01, %v526_v32  ;;  %v3247_v5 = vsel %vm682_vm9, %v3184_v28, %v714_v2  ;;  %v723_v10 = vmul.f32 0.01, %v533_v53 }
 0x1f9   :  { %v724_v11 = vmul.f32 0.01, %v540_v57  ;;  %v725_v13 = vmul.f32 0.01, %v547_v58  ;;  %v3252_v37 = vsel %vm683_vm10, %v3186_v33, %v715_v35  ;;  %v726_v14 = vmul.f32 0.01, %v554_v62 }
 0x1fa   :  { %v727_v27 = vmul.f32 0.01, %v561_v34  ;;  %v728_v16 = vmul.f32 0.01, %v568_v1  ;;  %v3257_v18 = vsel %vm684_vm11, %v3188_v41, %v716_v36  ;;  %v3262_v28 = vsel %vm685_vm12, %v3190_v49, %v717_v4 }
 0x1fb   :  { %v3267_v38 = vsel %vm686_vm13, %v3195_v54, %v718_v6  ;;  %v3272_v33 = vsel %vm687_vm14, %v3197_v59, %v719_v7  ;;  %v752_v41 = vsel %vm688_vm15, %v3213_v63, %v720_v9  ;;  %v753_v12 = vsel %vm689_vm3, %v519_v29, %v721_v26 }
 0x1fc   :  { %v754_v21 = vsel %vm690_vm4, %v526_v32, %v722_v31  ;;  %v755_v49 = vsel %vm691_vm5, %v533_v53, %v723_v10  ;;  %v3281_v45 = vsel %vm692_vm6, %v540_v57, %v724_v11  ;;  %v3284_v54 = vsel %vm693_vm2, %v547_v58, %v725_v13 }
 0x1fd   :  { %v3287_v22 = vsel %vm694_vm0, %v554_v62, %v726_v14  ;;  %v3290_v59 = vsel %vm695_vm7, %v561_v34, %v727_v27  ;;  %v760_v63 = vsel %vm696_vm1, %v568_v1, %v728_v16  ;;  %vm4143_vm8 = vcmask 1042434  }
 0x1fe   :  { %vm4142_vm9 = vcmask 1043459   ;;  %vm823_vm10 = vcmask 1044484   ;;  %vm4141_vm11 = vcmask 1045509   ;;  %vm4140_vm12 = vcmask 1046534  }
 0x1ff   :  { %vm4139_vm13 = vcmask 1047559   ;;  %vm4144_vm14 = vcmask 1041409   ;;  %v421_v26 = vrot.slane %v3150_v17, 4  ;;  %v422_v31 = vrot.slane %v3150_v17, 6 }
 0x200   :  { %v832_v19 = vsel %vm4144_vm14, %v753_v12, %v752_v41  ;;  %v890_v55 = vsel %vm4144_vm14, %v3247_v5, %v3241_v8  ;;  %v897_v25 = vsel %vm4144_vm14, %v754_v21, %v753_v12  ;;  %v860_v29 = vsel %vm4144_vm14, %v3252_v37, %v3247_v5 }
 0x201   :  { %v833_v32 = vsel %vm4143_vm8, %v754_v21, %v832_v19  ;;  %v891_v43 = vsel %vm4143_vm8, %v3252_v37, %v890_v55  ;;  %v898_v44 = vsel %vm4143_vm8, %v755_v49, %v897_v25  ;;  %v861_v50 = vsel %vm4143_vm8, %v3257_v18, %v860_v29 }
 0x202   :  { %v3309_v23 = vsel %vm4142_vm9, %v755_v49, %v833_v32  ;;  %v892_v51 = vsel %vm4142_vm9, %v3257_v18, %v891_v43  ;;  %v899_v40 = vsel %vm4142_vm9, %v3281_v45, %v898_v44  ;;  %v862_v53 = vsel %vm4142_vm9, %v3262_v28, %v861_v50 }
 0x203   :  { %v893_v56 = vsel %vm823_vm10, %v3262_v28, %v892_v51  ;;  %v900_v57 = vsel %vm823_vm10, %v3284_v54, %v899_v40  ;;  %v863_v58 = vsel %vm823_vm10, %v3267_v38, %v862_v53  ;;  %v867_v60 = vsel %vm4144_vm14, %v755_v49, %v754_v21 }
 0x204   :  { %v894_v46 = vsel %vm4141_vm11, %v3267_v38, %v893_v56  ;;  %v901_v61 = vsel %vm4141_vm11, %v3287_v22, %v900_v57  ;;  %v864_v62 = vsel %vm4141_vm11, %v3272_v33, %v863_v58  ;;  %v868_v34 = vsel %vm4143_vm8, %v3281_v45, %v867_v60 }
 0x205   :  { %v895_v0 = vsel %vm4140_vm12, %v3272_v33, %v894_v46  ;;  %v902_v1 = vsel %vm4140_vm12, %v3290_v59, %v901_v61  ;;  %v865_v47 = vsel %vm4140_vm12, %v752_v41, %v864_v62  ;;  %v869_v2 = vsel %vm4142_vm9, %v3284_v54, %v868_v34 }
 0x206   :  { %v896_v35 = vsel %vm4139_vm13, %v752_v41, %v895_v0  ;;  %v903_v36 = vsel %vm4139_vm13, %v760_v63, %v902_v1  ;;  %v866_v4 = vsel %vm4139_vm13, %v753_v12, %v865_v47  ;;  %v870_v6 = vsel %vm823_vm10, %v3287_v22, %v869_v2 }
 0x207   :  { %v2841_v7 = vpack.i.bf16 %v903_v36, %v896_v35  ;;  %v871_v9 = vsel %vm4141_vm11, %v3290_v59, %v870_v6  ;;  %v3351_v10 = vmax.f32 %v3164_v30, %v656_v52  ;;  %v423_v13 = vrot.slane %v3155_v39, 2 }
 0x208   :  { %v872_v11 = vsel %vm4140_vm12, %v760_v63, %v871_v9  ;;  %v424_v14 = vrot.slane %v3155_v39, 4  ;;  %vm4145_vm0 = vcmask 1046528   ;;  %v425_v16 = vrot.slane %v3155_v39, 6 }
 0x209   :  { %2842 = vrot.lane.b32.xlu2 %v2841_v7, %s2994_s8  ;;  %v888_v27 = vsel %vm4145_vm0, %v872_v11, 0.0  ;;  %v426_v41 = vrot.slane %v3157_v42, 2  ;;  %v427_v12 = vrot.slane %v3157_v42, 4  ;;  %vm4146_vm1 = vcmask 254976  }
 0x20a   :  { %v2846_v21 = vpack.i.bf16 %v888_v27, %v866_v4  ;;  %v569_v30 = vsel %vm4146_vm1, %v3150_v17, -inf  ;;  %vm4147_vm2 = vmmov %vm4146_vm1 }
 0x20b   :  { %v576_v52 = vsel %vm4147_vm2, %v420_v15, -inf  ;;  %vm4148_vm7 = vmmov %vm4146_vm1  ;;  %v570_v63 = vrot.slane %v569_v30, 4 }
 0x20c   :  { %v583_v49 = vsel %vm4148_vm7, %v421_v26, -inf  ;;  %v577_v19 = vrot.slane %v576_v52, 4  ;;  %vm4149_vm15 = vmmov %vm4146_vm1  ;;  %2847 = vrot.lane.b32.xlu1 %v2846_v21, %s2990_s26  ;;  %v428_v21 = vrot.slane %v3157_v42, 6 }
 0x20d   :  { %v584_v55 = vrot.slane %v583_v49, 4  ;;  %v590_v25 = vsel %vm4149_vm15, %v422_v31, -inf  ;;  %vm4150_vm3 = vmmov %vm4146_vm1  ;;  %v571_v17 = vmax.f32 %v569_v30, %v570_v63 }
 0x20e   :  { %v591_v29 = vrot.slane %v590_v25, 4  ;;  %v597_v32 = vsel %vm4150_vm3, %v3155_v39, -inf  ;;  %vm4151_vm4 = vmmov %vm4146_vm1  ;;  %v578_v50 = vmax.f32 %v576_v52, %v577_v19 }
 0x20f   :  { %v604_v43 = vsel %vm4151_vm4, %v423_v13, -inf  ;;  %vm4152_vm5 = vmmov %vm4146_vm1  ;;  %v585_v15 = vmax.f32 %v583_v49, %v584_v55  ;;  %v598_v51 = vrot.slane %v597_v32, 4  ;;  %v572_v58 = vrot.slane %v571_v17, 2 }
 0x210   :  { %v611_v44 = vsel %vm4152_vm5, %v424_v14, -inf  ;;  %v592_v40 = vmax.f32 %v590_v25, %v591_v29  ;;  %v605_v53 = vrot.slane %v604_v43, 4  ;;  %vm4153_vm6 = vmmov %vm4146_vm1  ;;  %v579_v60 = vrot.slane %v578_v50, 2 }
 0x211   :  { %v612_v56 = vrot.slane %v611_v44, 4  ;;  %v618_v57 = vsel %vm4153_vm6, %v425_v16, -inf  ;;  %v586_v46 = vrot.slane %v585_v15, 2  ;;  %v599_v61 = vmax.f32 %v597_v32, %v598_v51  ;;  %vm4154_vm0 = vmmov %vm4146_vm1 }
 0x212   :  { %v593_v62 = vrot.slane %v592_v40, 2  ;;  %v606_v34 = vmax.f32 %v604_v43, %v605_v53  ;;  %v619_v0 = vrot.slane %v618_v57, 4  ;;  %v573_v1 = vmax.f32 %v571_v17, %v572_v58  ;;  %vm4155_vm1 = vmmov %vm4154_vm0 }
 0x213   :  { %v613_v39 = vmax.f32 %v611_v44, %v612_v56  ;;  %v580_v47 = vmax.f32 %v578_v50, %v579_v60  ;;  %v587_v2 = vmax.f32 %v585_v15, %v586_v46  ;;  %v600_v35 = vrot.slane %v599_v61, 2  ;;  %vm4156_vm2 = vmmov %vm4154_vm0 }
 0x214   :  { %v594_v36 = vmax.f32 %v592_v40, %v593_v62  ;;  %v607_v4 = vrot.slane %v606_v34, 2  ;;  %v620_v7 = vmax.f32 %v618_v57, %v619_v0  ;;  %v574_v9 = vrot.slane %v573_v1, 1  ;;  %vm4157_vm7 = vmmov %vm4154_vm0 }
 0x215   :  { %v614_v6 = vrot.slane %v613_v39, 2  ;;  %v581_v26 = vrot.slane %v580_v47, 1  ;;  %v588_v31 = vrot.slane %v587_v2, 1  ;;  %v601_v11 = vmax.f32 %v599_v61, %v600_v35  ;;  %vm4158_vm15 = vmmov %vm4154_vm0 }
 0x216   :  { %v595_v13 = vrot.slane %v594_v36, 1  ;;  %v608_v14 = vmax.f32 %v606_v34, %v607_v4  ;;  %v621_v16 = vrot.slane %v620_v7, 2  ;;  %v3373_v30 = vmax.f32 %v573_v1, %v574_v9  ;;  %vm4159_vm3 = vmmov %vm4154_vm0 }
 0x217   :  { %v615_v27 = vmax.f32 %v613_v39, %v614_v6  ;;  %v3375_v52 = vmax.f32 %v580_v47, %v581_v26  ;;  %v602_v49 = vrot.slane %v601_v11, 1  ;;  %v3377_v63 = vmax.f32 %v587_v2, %v588_v31 }
 0x218   :  { %v609_v19 = vrot.slane %v608_v14, 1  ;;  %v622_v25 = vmax.f32 %v620_v7, %v621_v16  ;;  %v3379_v29 = vmax.f32 %v594_v36, %v595_v13  ;;  %v625_v32 = vsel %vm4154_vm0, %v3157_v42, -inf }
 0x219   :  { %v616_v55 = vrot.slane %v615_v27, 1  ;;  %v632_v43 = vsel %vm4155_vm1, %v426_v41, -inf  ;;  %v639_v44 = vsel %vm4156_vm2, %v427_v12, -inf  ;;  %v3385_v17 = vmax.f32 %v601_v11, %v602_v49 }
 0x21a   :  { %v3387_v50 = vmax.f32 %v608_v14, %v609_v19  ;;  %v623_v15 = vrot.slane %v622_v25, 1  ;;  %v626_v51 = vrot.slane %v625_v32, 4  ;;  %v633_v40 = vrot.slane %v632_v43, 4 }
 0x21b   :  { %v640_v53 = vrot.slane %v639_v44, 4  ;;  %v646_v56 = vsel %vm4157_vm7, %v428_v21, -inf  ;;  %v658_v57 = vrot.slane %v3351_v10, 1  ;;  %v3391_v58 = vmax.f32 %v615_v27, %v616_v55 }
 0x21c   :  { %v627_v60 = vmax.f32 %v625_v32, %v626_v51  ;;  %v647_v42 = vrot.slane %v646_v56, 4  ;;  %v663_v41 = vrot.slane %v3231_v3, 2  ;;  %v3394_v46 = vmax.f32 %v622_v25, %v623_v15 }
 0x21d   :  { %v634_v12 = vmax.f32 %v632_v43, %v633_v40  ;;  %v641_v61 = vmax.f32 %v639_v44, %v640_v53  ;;  %v667_v62 = vsel %vm4158_vm15, %v430_v48, -inf  ;;  %v3401_v35 = vmax.f32 %v3351_v10, %v658_v57 }
 0x21e   :  { %v628_v34 = vrot.slane %v627_v60, 2  ;;  %v648_v39 = vmax.f32 %v646_v56, %v647_v42  ;;  %v664_v0 = vmax.f32 %v3231_v3, %v663_v41  ;;  %v668_v1 = vrot.slane %v667_v62, 4 }
 0x21f   :  { %v635_v47 = vrot.slane %v634_v12, 2  ;;  %v642_v2 = vrot.slane %v641_v61, 2  ;;  %v674_v36 = vsel %vm4159_vm3, %v431_v24, -inf  ;;  %vm697_vm4 = vcmp.ge.f32.partialorder %v3373_v30, 0.0 }
 0x220   :  { %v629_v4 = vmax.f32 %v627_v60, %v628_v34  ;;  %v649_v6 = vrot.slane %v648_v39, 2  ;;  %v665_v7 = vrot.slane %v664_v0, 1  ;;  %v669_v9 = vmax.f32 %v667_v62, %v668_v1 }
 0x221   :  { %v636_v26 = vmax.f32 %v634_v12, %v635_v47  ;;  %v643_v48 = vmax.f32 %v641_v61, %v642_v2  ;;  %v675_v31 = vrot.slane %v674_v36, 4  ;;  %vm698_vm5 = vcmp.ge.f32.partialorder %v3375_v52, 0.0 }
 0x222   :  { %v630_v3 = vrot.slane %v629_v4, 1  ;;  %v650_v11 = vmax.f32 %v648_v39, %v649_v6  ;;  %v3407_v13 = vmax.f32 %v664_v0, %v665_v7  ;;  %v670_v14 = vrot.slane %v669_v9, 2 }
 0x223   :  { %v637_v10 = vrot.slane %v636_v26, 1  ;;  %v644_v20 = vrot.slane %v643_v48, 1  ;;  %v676_v27 = vmax.f32 %v674_v36, %v675_v31  ;;  %vm699_vm6 = vcmp.ge.f32.partialorder %v3377_v63, 0.0 }
 0x224   :  { %v631_v24 = vmax.f32 %v629_v4, %v630_v3  ;;  %v651_v16 = vrot.slane %v650_v11, 1  ;;  %v671_v21 = vmax.f32 %v669_v9, %v670_v14  ;;  %vm700_vm0 = vcmp.ge.f32.partialorder %v3379_v29, 0.0 }
 0x225   :  { %v638_v49 = vmax.f32 %v636_v26, %v637_v10  ;;  %v645_v19 = vmax.f32 %v643_v48, %v644_v20  ;;  %v677_v55 = vrot.slane %v676_v27, 2  ;;  %vm701_vm1 = vcmp.ge.f32.partialorder %v3385_v17, 0.0 }
 0x226   :  { %v652_v25 = vmax.f32 %v650_v11, %v651_v16  ;;  %v672_v32 = vrot.slane %v671_v21, 1  ;;  %vm702_vm2 = vcmp.ge.f32.partialorder %v3387_v50, 0.0  ;;  %vm703_vm7 = vcmp.ge.f32.partialorder %v3391_v58, 0.0 }
 0x227   :  { %v678_v43 = vmax.f32 %v676_v27, %v677_v55  ;;  %vm704_vm15 = vcmp.ge.f32.partialorder %v3394_v46, 0.0  ;;  %vm705_vm3 = vcmp.ge.f32.partialorder %v631_v24, 0.0  ;;  %vm706_vm13 = vcmp.ge.f32.partialorder %v638_v49, 0.0 }
 0x228   :  { %v673_v44 = vmax.f32 %v671_v21, %v672_v32  ;;  %vm707_vm12 = vcmp.ge.f32.partialorder %v645_v19, 0.0  ;;  %vm708_vm11 = vcmp.ge.f32.partialorder %v652_v25, 0.0  ;;  %vm709_vm9 = vcmp.ge.f32.partialorder %v3401_v35, 0.0 }
 0x229   :  { %v679_v15 = vrot.slane %v678_v43, 1  ;;  %vm710_vm8 = vcmp.ge.f32.partialorder %v3407_v13, 0.0  ;;  %v729_v51 = vmul.f32 0.01, %v3373_v30  ;;  %v730_v40 = vmul.f32 0.01, %v3375_v52 }
 0x22a   :  { %v731_v53 = vmul.f32 0.01, %v3377_v63  ;;  %v732_v56 = vmul.f32 0.01, %v3379_v29  ;;  %v835_v57 = vsel %vm823_vm10, %v3281_v45, %v3309_v23  ;;  %v733_v42 = vmul.f32 0.01, %v3385_v17 }
 0x22b   :  { %v680_v60 = vmax.f32 %v678_v43, %v679_v15  ;;  %v734_v41 = vmul.f32 0.01, %v3387_v50  ;;  %v735_v12 = vmul.f32 0.01, %v3391_v58  ;;  %v736_v61 = vmul.f32 0.01, %v3394_v46 }
 0x22c   :  { %v737_v62 = vmul.f32 0.01, %v631_v24  ;;  %v738_v34 = vmul.f32 0.01, %v638_v49  ;;  %v761_v39 = vsel %vm697_vm4, %v3373_v30, %v729_v51  ;;  %v739_v0 = vmul.f32 0.01, %v645_v19 }
 0x22d   :  { %vm712_vm14 = vcmp.ge.f32.partialorder %v680_v60, 0.0  ;;  %v740_v1 = vmul.f32 0.01, %v652_v25  ;;  %v762_v45 = vsel %vm698_vm5, %v3375_v52, %v730_v40  ;;  %v741_v23 = vmul.f32 0.01, %v3401_v35 }
 0x22e   :  { %v742_v47 = vmul.f32 0.01, %v3407_v13  ;;  %v743_v2 = vmul.f32 0.01, %v673_v44  ;;  %v763_v36 = vsel %vm699_vm6, %v3377_v63, %v731_v53  ;;  %v744_v4 = vmul.f32 0.01, %v680_v60 }
 0x22f   :  { %v764_v30 = vsel %vm700_vm0, %v3379_v29, %v732_v56  ;;  %v765_v6 = vsel %vm701_vm1, %v3385_v17, %v733_v42  ;;  %v3449_v52 = vsel %vm702_vm2, %v3387_v50, %v734_v41  ;;  %v3454_v7 = vsel %vm703_vm7, %v3391_v58, %v735_v12 }
 0x230   :  { %v768_v63 = vsel %vm704_vm15, %v3394_v46, %v736_v61  ;;  %v769_v29 = vsel %vm705_vm3, %v631_v24, %v737_v62  ;;  %v770_v9 = vsel %vm706_vm13, %v638_v49, %v738_v34  ;;  %v771_v17 = vsel %vm707_vm12, %v645_v19, %v739_v0 }
 0x231   :  { %v772_v26 = vsel %vm708_vm11, %v652_v25, %v740_v1  ;;  %v773_v50 = vsel %vm709_vm9, %v3401_v35, %v741_v23  ;;  %v774_v58 = vsel %vm710_vm8, %v3407_v13, %v742_v47  ;;  %vm4160_vm4 = vcmp.ge.f32.partialorder %v673_v44, 0.0 }
 0x232   :  { %v775_v48 = vsel %vm4160_vm4, %v673_v44, %v743_v2  ;;  %v776_v46 = vsel %vm712_vm14, %v680_v60, %v744_v4  ;;  %vm4161_vm5 = vcmask 1041409   ;;  %vm4163_vm13 = vcmask 1042434  }
 0x233   :  { %v845_v31 = vsel %vm4161_vm5, %v769_v29, %v768_v63  ;;  %vm4162_vm6 = vmmov %vm4161_vm5  ;;  %vm4167_vm9 = vcmask 1043459   ;;  %vm4174_vm3 = vcmask 1045509  }
 0x234   :  { %v904_v3 = vsel %vm4162_vm6, %v762_v45, %v761_v39  ;;  %v846_v11 = vsel %vm4163_vm13, %v770_v9, %v845_v31  ;;  %vm4164_vm12 = vmmov %vm4163_vm13 }
 0x235   :  { %v905_v14 = vsel %vm4164_vm12, %v763_v36, %v904_v3  ;;  %vm4165_vm11 = vmmov %vm4161_vm5  ;;  %v847_v20 = vsel %vm4167_vm9, %v771_v17, %v846_v11  ;;  %v2733_v3 = vld [vmem:[%s4130_s2 + $0x8] sm:$0xff] }
 0x236   :  { %v911_v10 = vsel %vm4165_vm11, %v770_v9, %v769_v29  ;;  %vm4166_vm0 = vmmov %vm4161_vm5  ;;  %vm4176_vm5 = vcmask 1046534   ;;  %vm4180_vm11 = vcmask 1047559  }
 0x237   :  { %v873_v35 = vsel %vm4166_vm0, %v763_v36, %v762_v45  ;;  %vm4168_vm1 = vmmov %vm4167_vm9 }
 0x238   :  { %v906_v13 = vsel %vm4168_vm1, %v764_v30, %v905_v14  ;;  %vm4169_vm8 = vmmov %vm4164_vm12 }
 0x239   :  { %v912_v27 = vsel %vm4169_vm8, %v771_v17, %v911_v10  ;;  %vm4170_vm2 = vmmov %vm4169_vm8  ;;  %v907_v16 = vsel %vm823_vm10, %v765_v6, %v906_v13 }
 0x23a   :  { %v874_v24 = vsel %vm4170_vm2, %v764_v30, %v873_v35  ;;  %vm4171_vm14 = vmmov %vm4168_vm1  ;;  %v908_v55 = vsel %vm4174_vm3, %v3449_v52, %v907_v16  ;;  %v2732_v35 = vld [vmem:[%s4130_s2] sm:$0xff] }
 0x23b   :  { %v913_v21 = vsel %vm4171_vm14, %v772_v26, %v912_v27  ;;  %vm4172_vm7 = vmmov %vm4168_vm1  ;;  %v909_v44 = vsel %vm4176_vm5, %v3454_v7, %v908_v55 }
 0x23c   :  { %v875_v49 = vsel %vm4172_vm7, %v765_v6, %v874_v24  ;;  %vm4173_vm15 = vmmov %vm4166_vm0  ;;  %v914_v25 = vsel %vm823_vm10, %v773_v50, %v913_v21  ;;  %v910_v53 = vsel %vm4180_vm11, %v768_v63, %v909_v44 }
 0x23d   :  { %v880_v19 = vsel %vm4173_vm15, %v771_v17, %v770_v9  ;;  %v876_v32 = vsel %vm823_vm10, %v3449_v52, %v875_v49  ;;  %vm4175_vm4 = vmmov %vm4170_vm2  ;;  %v2737_v9 = vld [vmem:[%s4130_s2 + $0x28] sm:$0xff] }
 0x23e   :  { %v881_v43 = vsel %vm4175_vm4, %v772_v26, %v880_v19  ;;  %vm4177_vm6 = vmmov %vm4174_vm3  ;;  %1000 = vmatpush.bf16.msra.mxu0 %v2737_v9 }
 0x23f   :  { %v915_v15 = vsel %vm4177_vm6, %v774_v58, %v914_v25  ;;  %vm4178_vm13 = vmmov %vm4174_vm3 }
 0x240   :  { %v877_v51 = vsel %vm4178_vm13, %v3454_v7, %v876_v32  ;;  %vm4179_vm12 = vmmov %vm4168_vm1 }
 0x241   :  { %v882_v40 = vsel %vm4179_vm12, %v773_v50, %v881_v43  ;;  %vm4181_vm0 = vmmov %vm4176_vm5 }
 0x242   :  { %v916_v56 = vsel %vm4181_vm0, %v775_v48, %v915_v15  ;;  %vm4182_vm9 = vmmov %vm4181_vm0  ;;  %v883_v42 = vsel %vm823_vm10, %v774_v58, %v882_v40 }
 0x243   :  { %v878_v60 = vsel %vm4182_vm9, %v768_v63, %v877_v51  ;;  %vm4183_vm1 = vmmov %vm4180_vm11 }
 0x244   :  { %v917_v41 = vsel %vm4183_vm1, %v776_v46, %v916_v56  ;;  %vm4184_vm8 = vmmov %vm4183_vm1 }
 0x245   :  { %v879_v12 = vsel %vm4184_vm8, %v769_v29, %v878_v60  ;;  %vm4185_vm2 = vmmov %vm4174_vm3  ;;  %v2851_v34 = vpack.i.bf16 %v917_v41, %v910_v53 }
 0x246   :  { %v884_v61 = vsel %vm4185_vm2, %v775_v48, %v883_v42  ;;  %vm4186_vm14 = vmmov %vm4185_vm2 }
 0x247   :  { %v836_v62 = vsel %vm4186_vm14, %v3284_v54, %v835_v57  ;;  %vm4187_vm7 = vmmov %vm4181_vm0  ;;  %2852 = vrot.lane.b32.xlu2 %v2851_v34, %s2994_s8 }
 0x248   :  { %v885_v0 = vsel %vm4187_vm7, %v776_v46, %v884_v61  ;;  %vm4188_vm15 = vmmov %vm4181_vm0 }
 0x249   :  { %v837_v1 = vsel %vm4188_vm15, %v3287_v22, %v836_v62  ;;  %vm4189_vm3 = vmmov %vm4175_vm4  ;;  %vm4190_vm4 = vcmask 1046528  }
 0x24a   :  { %v820_v23 = vsel %vm4189_vm3, %v3247_v5, %v3241_v8  ;;  %v889_v47 = vsel %vm4190_vm4, %v885_v0, 0.0  ;;  %vm4191_vm5 = vmmov %vm4183_vm1  ;;  %v848_v8 = vsel %vm823_vm10, %v772_v26, %v847_v20  ;;  %vm4204_vm4 = vcmask 1040384  }
 0x24b   :  { %v838_v2 = vsel %vm4191_vm5, %v3290_v59, %v837_v1  ;;  %vm4192_vm6 = vmmov %vm4179_vm12  ;;  %v2856_v57 = vpack.i.bf16 %v889_v47, %v879_v12 }
 0x24c   :  { %v822_v4 = vsel %vm4192_vm6, %v3252_v37, %v820_v23  ;;  %vm4193_vm13 = vmmov %vm4189_vm3  ;;  %vm948_vm3 = vcmask 523264  }
 0x24d   :  { %v839_v54 = vsel %vm4193_vm13, %v762_v45, %v761_v39  ;;  %v824_v22 = vsel %vm823_vm10, %v3257_v18, %v822_v4  ;;  %vm4194_vm12 = vmmov %vm4192_vm6  ;;  %2857 = vrot.lane.b32.xlu1 %v2856_v57, %s2990_s26  ;;  %vm991_vm13 = vcmask 785408  }
 0x24e   :  { %v840_v63 = vsel %vm4194_vm12, %v763_v36, %v839_v54  ;;  %vm4195_vm11 = vmmov %vm4185_vm2 }
 0x24f   :  { %v826_v5 = vsel %vm4195_vm11, %v3262_v28, %v824_v22  ;;  %v841_v59 = vsel %vm823_vm10, %v764_v30, %v840_v63  ;;  %vm4196_vm0 = vmmov %vm4185_vm2 }
 0x250   :  { %v849_v29 = vsel %vm4196_vm0, %v773_v50, %v848_v8  ;;  %vm4197_vm9 = vmmov %vm4187_vm7 }
 0x251   :  { %v828_v37 = vsel %vm4197_vm9, %v3267_v38, %v826_v5  ;;  %vm4198_vm1 = vmmov %vm4196_vm0  ;;  %v2736_v38 = vld [vmem:[%s4130_s2 + $0x20] sm:$0xff]  ;;  %vm1045_vm9 = vcmask 517120  }
 0x252   :  { %v842_v39 = vsel %vm4198_vm1, %v765_v6, %v841_v59  ;;  %vm4199_vm8 = vmmov %vm4187_vm7  ;;  %1001 = vmatpush.bf16.msra.mxu0 %v2736_v38  ;;  %vm4210_vm1 = vcmask 1042434  }
 0x253   :  { %v850_v18 = vsel %vm4199_vm8, %v774_v58, %v849_v29  ;;  %vm4200_vm2 = vmmov %vm4191_vm5  ;;  %vm4205_vm5 = vcmask 261120   ;;  %vm4211_vm8 = vcmask 1043459  }
 0x254   :  { %v830_v45 = vsel %vm4200_vm2, %v3272_v33, %v828_v37  ;;  %vm4201_vm14 = vmmov %vm4187_vm7  ;;  %v2735_v33 = vld [vmem:[%s4130_s2 + $0x18] sm:$0xff] }
 0x255   :  { %v843_v36 = vsel %vm4201_vm14, %v3449_v52, %v842_v39  ;;  %vm4202_vm7 = vmmov %vm4200_vm2  ;;  %v856_v50 = vsel %vm4204_vm4, 0.0, %v830_v45 }
 0x256   :  { %v851_v28 = vsel %vm4202_vm7, %v775_v48, %v850_v18  ;;  %vm4203_vm15 = vmmov %vm4200_vm2  ;;  %1002 = vmatpush.bf16.msra.mxu0 %v2735_v33  ;;  %vm4212_vm2 = vcmask 1045509   ;;  %vm4213_vm7 = vcmask 1041409  }
 0x257   :  { %v844_v30 = vsel %vm4203_vm15, %v3454_v7, %v843_v36  ;;  %v2734_v7 = vld [vmem:[%s4130_s2 + $0x10] sm:$0xff]  ;;  %vm4206_vm6 = vmmov %vm4205_vm5 }
 0x258   :  { %vm4207_vm12 = vmmov %vm4204_vm4 }
 0x259   :  { %v857_v16 = vsel %vm4207_vm12, 0.0, %v844_v30  ;;  %vm4208_vm11 = vmmov %vm4205_vm5 }
 0x25a   :  { %1003 = vmatpush.bf16.msra.mxu0 %v2734_v7  ;;  %vm4209_vm0 = vmmov %vm4205_vm5 }
 0x25b   :  { %vm4214_vm4 = vmmov %vm4213_vm7 }
 0x25c   :  { %vm4218_vm12 = vmmov %vm4214_vm4 }
 0x25e   :  { %1004 = vmatpush.bf16.msra.mxu0 %v2733_v3 }
 0x262   :  { %1005 = vmatpush.bf16.msra.mxu0 %v2732_v35 }
 0x263   :  { %v2843_v6 = vpop.permute.xlu2 %2842 }
 0x264   :  { %v2845_v52 = vunpack.i.h.bf16 %v2843_v6  ;;  %v2844_v17 = vunpack.i.l.bf16 %v2843_v6 }
 0x266   :  { %v945_v46 = vsel %vm4205_vm5, %v838_v2, %v2845_v52  ;;  %v944_v31 = vsel %vm4206_vm6, %v856_v50, %v2844_v17  ;;  %vm4215_vm5 = vmmov %vm4210_vm1 }
 0x267   :  { %vm4216_vm6 = vmmov %vm4210_vm1 }
 0x27e   :  { %v2848_v26 = vpop.permute.xlu1 %2847 }
 0x27f   :  { %v2850_v58 = vunpack.i.h.bf16 %v2848_v26  ;;  %v2849_v48 = vunpack.i.l.bf16 %v2848_v26 }
 0x281   :  { %v949_v11 = vsel %vm948_vm3, %v944_v31, %v2849_v48  ;;  %v950_v14 = vsel %vm948_vm3, %v945_v46, %v2850_v58 }
 0x282   :  { %v953_v10 = vpack.c.bf16 %v950_v14, %v949_v11 }
 0x284   :  { %2361 = vmatmul.msk.bf16.vlgmr.msra.gmra.mxu0 %vm991_vm13, %v953_v10 }
 0x2a1   :  { %v2853_v20 = vpop.permute.xlu2 %2852 }
 0x2a2   :  { %v2855_v13 = vunpack.i.h.bf16 %v2853_v20  ;;  %v2854_v27 = vunpack.i.l.bf16 %v2853_v20 }
 0x2a4   :  { %v947_v19 = vsel %vm4208_vm11, %v851_v28, %v2855_v13  ;;  %v946_v55 = vsel %vm4209_vm0, %v857_v16, %v2854_v27  ;;  %vm4219_vm11 = vmmov %vm4211_vm8 }
 0x2a5   :  { %vm4220_vm0 = vmmov %vm4210_vm1 }
 0x2bf   :  { %v2858_v24 = vpop.permute.xlu1 %2857 }
 0x2c0   :  { %v2860_v21 = vunpack.i.h.bf16 %v2858_v24  ;;  %v2859_v49 = vunpack.i.l.bf16 %v2858_v24 }
 0x2c2   :  { %v951_v25 = vsel %vm948_vm3, %v946_v55, %v2859_v49  ;;  %v952_v32 = vsel %vm948_vm3, %v947_v19, %v2860_v21  ;;  %v2749_v19 = vld [vmem:[#allocation2 + $0x58] sm:$0xff] }
 0x2c3   :  { %v954_v43 = vpack.c.bf16 %v952_v32, %v951_v25  ;;  %1363 = vmatpush.bf16.msra.mxu2 %v2749_v19  ;;  %v2748_v25 = vld [vmem:[#allocation2 + $0x50] sm:$0xff] }
 0x2c5   :  { %2362 = vmatmul.msk.bf16.gmra.mxu0 %vm991_vm13, %v954_v43  ;;  %vm4217_vm13 = vmmov %vm4211_vm8 }
 0x2c7   :  { %1364 = vmatpush.bf16.msra.mxu2 %v2748_v25 }
 0x301   :  { %v1007_v44 = vpop.f32.mrf.mxu0 }
 0x302   :  { %v1021_v15 = vrot.slane %v1007_v44, 2  ;;  %v1022_v51 = vrot.slane %v1007_v44, 4  ;;  %v1023_v40 = vrot.slane %v1007_v44, 6  ;;  %v1046_v53 = vsel %vm1045_vm9, %v1007_v44, -inf }
 0x303   :  { %v1047_v61 = vrot.slane %v1046_v53, 4 }
 0x304   :  { %v1053_v56 = vsel %vm1045_vm9, %v1021_v15, -inf  ;;  %v1060_v60 = vsel %vm1045_vm9, %v1022_v51, -inf  ;;  %v1067_v12 = vsel %vm1045_vm9, %v1023_v40, -inf }
 0x305   :  { %v1054_v42 = vrot.slane %v1053_v56, 4  ;;  %v1061_v41 = vrot.slane %v1060_v60, 4  ;;  %v1068_v34 = vrot.slane %v1067_v12, 4  ;;  %v1048_v2 = vmax.f32 %v1046_v53, %v1047_v61 }
 0x307   :  { %v1055_v62 = vmax.f32 %v1053_v56, %v1054_v42  ;;  %v1062_v1 = vmax.f32 %v1060_v60, %v1061_v41  ;;  %v1069_v57 = vmax.f32 %v1067_v12, %v1068_v34  ;;  %v1049_v8 = vrot.slane %v1048_v2, 2  ;;  %v2747_v12 = vld [vmem:[#allocation2 + $0x48] sm:$0xff] }
 0x308   :  { %1365 = vmatpush.bf16.msra.mxu2 %v2747_v12 }
 0x309   :  { %v1009_v0 = vpop.f32.mrf.mxu0  ;;  %v1056_v54 = vrot.slane %v1055_v62, 2  ;;  %v1063_v63 = vrot.slane %v1062_v1, 2  ;;  %v1070_v29 = vrot.slane %v1069_v57, 2  ;;  %v1050_v45 = vmax.f32 %v1048_v2, %v1049_v8 }
 0x30a   :  { %v1024_v23 = vrot.slane %v1009_v0, 2  ;;  %v1074_v47 = vsel %vm1045_vm9, %v1009_v0, -inf  ;;  %v1025_v37 = vrot.slane %v1009_v0, 4  ;;  %v1026_v31 = vrot.slane %v1009_v0, 6 }
 0x30b   :  { %v1075_v22 = vrot.slane %v1074_v47, 4  ;;  %v1057_v59 = vmax.f32 %v1055_v62, %v1056_v54  ;;  %v1064_v18 = vmax.f32 %v1062_v1, %v1063_v63  ;;  %v1071_v30 = vmax.f32 %v1069_v57, %v1070_v29  ;;  %v2746_v63 = vld [vmem:[#allocation2 + $0x40] sm:$0xff] }
 0x30c   :  { %v1081_v4 = vsel %vm1045_vm9, %v1024_v23, -inf  ;;  %v1088_v38 = vsel %vm1045_vm9, %v1025_v37, -inf  ;;  %v1051_v33 = vrot.slane %v1050_v45, 1  ;;  %v1095_v20 = vsel %vm1045_vm9, %v1026_v31, -inf  ;;  %1366 = vmatpush.bf16.msra.mxu2 %v2746_v63 }
 0x30d   :  { %v1082_v5 = vrot.slane %v1081_v4, 4  ;;  %v1076_v39 = vmax.f32 %v1074_v47, %v1075_v22  ;;  %v1058_v28 = vrot.slane %v1057_v59, 1  ;;  %v1065_v6 = vrot.slane %v1064_v18, 1 }
 0x30e   :  { %v1089_v17 = vrot.slane %v1088_v38, 4  ;;  %v1072_v26 = vrot.slane %v1071_v30, 1  ;;  %v1052_v48 = vmax.f32 %v1050_v45, %v1051_v33  ;;  %v1096_v16 = vrot.slane %v1095_v20, 4 }
 0x30f   :  { %v1083_v36 = vmax.f32 %v1081_v4, %v1082_v5  ;;  %v1077_v9 = vrot.slane %v1076_v39, 2  ;;  %v1059_v7 = vmax.f32 %v1057_v59, %v1058_v28  ;;  %v1066_v58 = vmax.f32 %v1064_v18, %v1065_v6  ;;  %v2744_v6 = vld [vmem:[#allocation2 + $0x30] sm:$0xff] }
 0x310   :  { %v1090_v3 = vmax.f32 %v1088_v38, %v1089_v17  ;;  %v1073_v11 = vmax.f32 %v1071_v30, %v1072_v26  ;;  %v1097_v44 = vmax.f32 %v1095_v20, %v1096_v16 }
 0x311   :  { %v1084_v52 = vrot.slane %v1083_v36, 2  ;;  %v1078_v50 = vmax.f32 %v1076_v39, %v1077_v9  ;;  %2870 = vtanh.f32 %v1059_v7  ;;  %v2745_v39 = vld [vmem:[#allocation2 + $0x38] sm:$0xff] }
 0x312   :  { %2872 = vtanh.f32 %v1066_v58  ;;  %v1091_v35 = vrot.slane %v1090_v3, 2  ;;  %v1098_v62 = vrot.slane %v1097_v44, 2  ;;  %1345 = vmatpush.bf16.msra.mxu1 %v2745_v39 }
 0x313   :  { %v1085_v46 = vmax.f32 %v1083_v36, %v1084_v52  ;;  %v1079_v14 = vrot.slane %v1078_v50, 1  ;;  %2874 = vtanh.f32 %v1052_v48 }
 0x314   :  { %2876 = vtanh.f32 %v1073_v11  ;;  %v1092_v49 = vmax.f32 %v1090_v3, %v1091_v35  ;;  %v1099_v18 = vmax.f32 %v1097_v44, %v1098_v62 }
 0x315   :  { %v1086_v10 = vrot.slane %v1085_v46, 1  ;;  %v1080_v13 = vmax.f32 %v1078_v50, %v1079_v14 }
 0x316   :  { %v1093_v51 = vrot.slane %v1092_v49, 1  ;;  %1346 = vmatpush.bf16.msra.mxu1 %v2744_v6 }
 0x317   :  { %v3575_v27 = vpop.eup %2870  ;;  %v1087_v24 = vmax.f32 %v1085_v46, %v1086_v10  ;;  %2878 = vtanh.f32 %v1080_v13  ;;  %v2743_v13 = vld [vmem:[#allocation2 + $0x28] sm:$0xff] }
 0x318   :  { %v3577_v21 = vpop.eup %2872  ;;  %v1094_v0 = vmax.f32 %v1092_v49, %v1093_v51 }
 0x319   :  { %v3579_v55 = vpop.eup %2874  ;;  %2880 = vtanh.f32 %v1087_v24 }
 0x31a   :  { %v1212_v32 = vsel %vm4210_vm1, %v3575_v27, %v3579_v55  ;;  %v3584_v43 = vpop.eup %2876  ;;  %2882 = vtanh.f32 %v1094_v0  ;;  %1347 = vmatpush.bf16.msra.mxu1 %v2743_v13  ;;  %vm4222_vm1 = vmmov %vm4220_vm0 }
 0x31b   :  { %v1213_v15 = vsel %vm4211_vm8, %v3577_v21, %v1212_v32 }
 0x31c   :  { %v1214_v40 = vsel %vm823_vm10, %v3584_v43, %v1213_v15 }
 0x31d   :  { %v3591_v61 = vpop.eup %2878 }
 0x31e   :  { %v1215_v8 = vsel %vm4212_vm2, %v3591_v61, %v1214_v40 }
 0x31f   :  { %v3596_v2 = vpop.eup %2880 }
 0x320   :  { %v1216_v45 = vsel %vm4201_vm14, %v3596_v2, %v1215_v8  ;;  %v3606_v24 = vpop.eup %2882  ;;  %v2741_v8 = vld [vmem:[#allocation2 + $0x18] sm:$0xff] }
 0x321   :  { %v3613_v12 = vsel %vm4203_vm15, %v3606_v24, %v1216_v45  ;;  %vm4226_vm15 = vmmov %vm4220_vm0 }
 0x342   :  { %v1012_v53 = vpop.f32.mrf.mxu0 }
 0x343   :  { %v1027_v56 = vrot.slane %v1012_v53, 2  ;;  %v1028_v60 = vrot.slane %v1012_v53, 4  ;;  %v1029_v42 = vrot.slane %v1012_v53, 6  ;;  %v1102_v41 = vsel %vm1045_vm9, %v1012_v53, -inf }
 0x344   :  { %v1103_v34 = vrot.slane %v1102_v41, 4 }
 0x345   :  { %v1109_v1 = vsel %vm1045_vm9, %v1027_v56, -inf  ;;  %v1116_v23 = vsel %vm1045_vm9, %v1028_v60, -inf  ;;  %v1123_v47 = vsel %vm1045_vm9, %v1029_v42, -inf  ;;  %v1100_v60 = vrot.slane %v1099_v18, 1 }
 0x346   :  { %v1104_v4 = vmax.f32 %v1102_v41, %v1103_v34  ;;  %v1110_v54 = vrot.slane %v1109_v1, 4  ;;  %v1117_v57 = vrot.slane %v1116_v23, 4  ;;  %v1124_v22 = vrot.slane %v1123_v47, 4  ;;  %v2742_v41 = vld [vmem:[#allocation2 + $0x20] sm:$0xff] }
 0x347   :  { %v1246_v42 = vsel %vm4213_vm7, %v3575_v27, %v3579_v55  ;;  %1348 = vmatpush.bf16.msra.mxu1 %v2742_v41  ;;  %vm4225_vm7 = vmmov %vm4212_vm2 }
 0x348   :  { %v1105_v5 = vrot.slane %v1104_v4, 2  ;;  %v1111_v59 = vmax.f32 %v1109_v1, %v1110_v54  ;;  %v1118_v29 = vmax.f32 %v1116_v23, %v1117_v57  ;;  %v1125_v37 = vmax.f32 %v1123_v47, %v1124_v22 }
 0x349   :  { %v1230_v23 = vsel %vm4214_vm4, %v3577_v21, %v3575_v27  ;;  %v1101_v57 = vmax.f32 %v1099_v18, %v1100_v60  ;;  %v1247_v63 = vsel %vm4215_vm5, %v3577_v21, %v1246_v42  ;;  %vm4228_vm5 = vmmov %vm4212_vm2 }
 0x34a   :  { %v1106_v36 = vmax.f32 %v1104_v4, %v1105_v5  ;;  %v1112_v28 = vrot.slane %v1111_v59, 2  ;;  %v1119_v30 = vrot.slane %v1118_v29, 2  ;;  %v1126_v9 = vrot.slane %v1125_v37, 2  ;;  %v1014_v38 = vpop.f32.mrf.mxu0 }
 0x34b   :  { %v1030_v33 = vrot.slane %v1014_v38, 2  ;;  %v1031_v52 = vrot.slane %v1014_v38, 4  ;;  %v1032_v17 = vrot.slane %v1014_v38, 6  ;;  %v1130_v7 = vsel %vm1045_vm9, %v1014_v38, -inf  ;;  %1349 = vmatpush.bf16.msra.mxu1 %v2741_v8  ;;  %v2740_v38 = vld [vmem:[#allocation2 + $0x10] sm:$0xff] }
 0x34c   :  { %v1107_v26 = vrot.slane %v1106_v36, 1  ;;  %v1113_v50 = vmax.f32 %v1111_v59, %v1112_v28  ;;  %v1120_v58 = vmax.f32 %v1118_v29, %v1119_v30  ;;  %v1127_v48 = vmax.f32 %v1125_v37, %v1126_v9  ;;  %v2781_v8 = vld [vmem:[%s4132_s4 + $0xf4] sm:$0xf0] }
 0x34d   :  { %v1131_v46 = vrot.slane %v1130_v7, 4  ;;  %v1137_v31 = vsel %vm1045_vm9, %v1030_v33, -inf  ;;  %v1144_v3 = vsel %vm1045_vm9, %v1031_v52, -inf  ;;  %v1151_v11 = vsel %vm1045_vm9, %v1032_v17, -inf  ;;  %vm4221_vm9 = vmmov %vm4211_vm8 }
 0x34e   :  { %v1108_v14 = vmax.f32 %v1106_v36, %v1107_v26  ;;  %v1114_v10 = vrot.slane %v1113_v50, 1  ;;  %v1121_v35 = vrot.slane %v1120_v58, 1  ;;  %v1128_v20 = vrot.slane %v1127_v48, 1  ;;  %vm4223_vm8 = vmmov %vm4214_vm4 }
 0x34f   :  { %v1132_v16 = vmax.f32 %v1130_v7, %v1131_v46  ;;  %v1138_v49 = vrot.slane %v1137_v31, 4  ;;  %v1145_v19 = vrot.slane %v1144_v3, 4  ;;  %v1152_v25 = vrot.slane %v1151_v11, 4  ;;  %1350 = vmatpush.bf16.msra.mxu1 %v2740_v38  ;;  %vm4224_vm14 = vmmov %vm4221_vm9  ;;  %v2777_v38 = vld [vmem:[%s4132_s4 + $0xd4] sm:$0xf0] }
 0x350   :  { %v1115_v32 = vmax.f32 %v1113_v50, %v1114_v10  ;;  %v1122_v44 = vmax.f32 %v1120_v58, %v1121_v35  ;;  %v1129_v15 = vmax.f32 %v1127_v48, %v1128_v20  ;;  %2884 = vtanh.f32 %v1108_v14  ;;  %v2739_v48 = vld [vmem:[#allocation2 + $0x8] sm:$0xff]  ;;  %vm4227_vm4 = vmmov %vm4221_vm9 }
 0x351   :  { %v1133_v51 = vrot.slane %v1132_v16, 2  ;;  %v1139_v40 = vmax.f32 %v1137_v31, %v1138_v49  ;;  %v1146_v53 = vmax.f32 %v1144_v3, %v1145_v19  ;;  %v1153_v56 = vmax.f32 %v1151_v11, %v1152_v25 }
 0x352   :  { %2886 = vtanh.f32 %v1115_v32  ;;  %v1231_v37 = vsel %vm4216_vm6, %v3584_v43, %v1230_v23  ;;  %v1248_v9 = vsel %vm4219_vm11, %v3584_v43, %v1247_v63  ;;  %vm4229_vm6 = vcmask 1046534  }
 0x353   :  { %2888 = vtanh.f32 %v1122_v44  ;;  %v1134_v62 = vmax.f32 %v1132_v16, %v1133_v51  ;;  %v1140_v34 = vrot.slane %v1139_v40, 2  ;;  %v1147_v0 = vrot.slane %v1146_v53, 2  ;;  %1351 = vmatpush.bf16.msra.mxu1 %v2739_v48  ;;  %vm4232_vm11 = vmmov %vm4229_vm6  ;;  %v2446_v48 = vld [vmem:[%s4132_s4 + $0x40] sm:$0xf] }
 0x354   :  { %v1154_v1 = vrot.slane %v1153_v56, 2  ;;  %2890 = vtanh.f32 %v1129_v15  ;;  %v1232_v45 = vsel %vm4217_vm13, %v3591_v61, %v1231_v37  ;;  %v1249_v52 = vsel %vm823_vm10, %v3591_v61, %v1248_v9  ;;  %vm4230_vm13 = vmmov %vm4212_vm2 }
 0x355   :  { %v1135_v47 = vrot.slane %v1134_v62, 1  ;;  %v1141_v4 = vmax.f32 %v1139_v40, %v1140_v34  ;;  %v1148_v54 = vmax.f32 %v1146_v53, %v1147_v0  ;;  %v1233_v17 = vsel %vm823_vm10, %v3596_v2, %v1232_v45 }
 0x356   :  { %v2885_v55 = vpop.eup %2884  ;;  %v1155_v22 = vmax.f32 %v1153_v56, %v1154_v1  ;;  %v1250_v58 = vsel %vm4212_vm2, %v3596_v2, %v1249_v52  ;;  %v1234_v31 = vsel %vm4225_vm7, %v3606_v24, %v1233_v17  ;;  %vm4239_vm7 = vcmask 1046528   ;;  %v2598_v52 = vld [vmem:[%s4132_s4 + $0x170] sm:$0xf]  ;;  %v2797_v17 = vld [vmem:[%s4132_s4 + $0x174] sm:$0xf0] }
 0x357   :  { %v1136_v5 = vmax.f32 %v1134_v62, %v1135_v47  ;;  %v1142_v59 = vrot.slane %v1141_v4, 1  ;;  %v1149_v29 = vrot.slane %v1148_v54, 1  ;;  %v1251_v2 = vsel %vm4229_vm6, %v3606_v24, %v1250_v58  ;;  %v2738_v62 = vld [vmem:[#allocation2] sm:$0xff] }
 0x358   :  { %v2887_v39 = vpop.eup %2886  ;;  %v1156_v27 = vrot.slane %v1155_v22, 1  ;;  %1352 = vmatpush.bf16.msra.mxu1 %v2738_v62 }
 0x359   :  { %v2889_v36 = vpop.eup %2888  ;;  %v1143_v28 = vmax.f32 %v1141_v4, %v1142_v59  ;;  %v1150_v18 = vmax.f32 %v1148_v54, %v1149_v29  ;;  %2892 = vtanh.f32 %v1136_v5  ;;  %v1253_v30 = vsel %vm4218_vm12, %v2887_v39, %v2885_v55  ;;  %vm4231_vm12 = vmmov %vm4229_vm6  ;;  %v2462_v59 = vld [vmem:[%s4132_s4 + $0x60] sm:$0xf]  ;;  %v2763_v29 = vld [vmem:[%s4132_s4 + $0x64] sm:$0xf0] }
 0x35a   :  { %2894 = vtanh.f32 %v1101_v57  ;;  %v1157_v21 = vmax.f32 %v1155_v22, %v1156_v27  ;;  %v1218_v6 = vsel %vm4220_vm0, %v2887_v39, %v2885_v55  ;;  %v2891_v33 = vpop.eup %2890  ;;  %v1254_v26 = vsel %vm4222_vm1, %v2889_v36, %v1253_v30  ;;  %vm4233_vm0 = vmmov %vm4229_vm6  ;;  %v2470_v57 = vld [vmem:[%s4132_s4 + $0x70] sm:$0xf]  ;;  %v2765_v22 = vld [vmem:[%s4132_s4 + $0x74] sm:$0xf0] }
 0x35b   :  { %2896 = vtanh.f32 %v1143_v28  ;;  %v1219_v7 = vsel %vm4221_vm9, %v2889_v36, %v1218_v6  ;;  %v1236_v50 = vsel %vm4223_vm8, %v2889_v36, %v2887_v39  ;;  %v1255_v61 = vsel %vm4224_vm14, %v2891_v33, %v1254_v26  ;;  %vm4234_vm9 = vmmov %vm4212_vm2  ;;  %v2526_v39 = vld [vmem:[%s4132_s4 + $0xe0] sm:$0xf]  ;;  %v2779_v27 = vld [vmem:[%s4132_s4 + $0xe4] sm:$0xf0] }
 0x35c   :  { %2898 = vtanh.f32 %v1150_v18  ;;  %v1220_v43 = vsel %vm823_vm10, %v2891_v33, %v1219_v7  ;;  %v1237_v3 = vsel %vm4226_vm15, %v2891_v33, %v1236_v50  ;;  %vm4235_vm1 = vcmask 1047559   ;;  %vm4238_vm14 = vmmov %vm4233_vm0  ;;  %v2454_v28 = vld [vmem:[%s4132_s4 + $0x50] sm:$0xf]  ;;  %v2761_v18 = vld [vmem:[%s4132_s4 + $0x54] sm:$0xf0] }
 0x35d   :  { %2900 = vtanh.f32 %v1157_v21  ;;  %vm4236_vm8 = vmmov %vm4235_vm1  ;;  %vm4241_vm15 = vcmask 1040384   ;;  %v2471_v63 = vor.u32 %v2765_v22, %v2470_v57  ;;  %v2463_v37 = vor.u32 %v2763_v29, %v2462_v59  ;;  %v2518_v30 = vld [vmem:[%s4132_s4 + $0xd0] sm:$0xf] }
 0x35e   :  { %vm4237_vm2 = vmmov %vm4235_vm1  ;;  %v1226_v23 = vsel %vm4241_vm15, 0.0, %v3613_v12  ;;  %v2534_v12 = vld [vmem:[%s4132_s4 + $0xf0] sm:$0xf]  ;;  %v2527_v45 = vor.u32 %v2779_v27, %v2526_v39  ;;  %v2455_v9 = vor.u32 %v2761_v18, %v2454_v28  ;;  %v2519_v33 = vor.u32 %v2777_v38, %v2518_v30  ;;  %v2464_v28 = vld [vmem:[%s4132_s4 + $0x68] sm:$0xf0] }
 0x35f   :  { %v2893_v46 = vpop.eup %2892  ;;  %v2535_v5 = vor.u32 %v2781_v8, %v2534_v12  ;;  %1796 = vmatpush.bf16.msra.mxu3 %v2471_v63  ;;  %v2599_v7 = vor.u32 %v2797_v17, %v2598_v52  ;;  %v2502_v27 = vld [vmem:[%s4132_s4 + $0xb0] sm:$0xf]  ;;  %vm1537_vm6 = vcmask 1043456  }
 0x360   :  { %v2895_v11 = vpop.eup %2894  ;;  %v1256_v14 = vsel %vm823_vm10, %v2893_v46, %v1255_v61  ;;  %v1238_v10 = vsel %vm4227_vm4, %v2893_v46, %v1237_v3  ;;  %v1221_v35 = vsel %vm4228_vm5, %v2893_v46, %v1220_v43  ;;  %vm4242_vm4 = vmmov %vm4241_vm15  ;;  %v2759_v61 = vld [vmem:[%s4132_s4 + $0x44] sm:$0xf0]  ;;  %v2582_v18 = vld [vmem:[%s4132_s4 + $0x150] sm:$0xf]  ;;  %vm1522_vm5 = vcmask 1042432  }
 0x361   :  { %v2897_v20 = vpop.eup %2896  ;;  %v1235_v49 = vsel %vm4231_vm12, %v2895_v11, %v1234_v31  ;;  %v1252_v40 = vsel %vm4236_vm8, %v2895_v11, %v1251_v2  ;;  %1809 = vmatpush.bf16.msrb.mxu2 %v2535_v5  ;;  %1822 = vmatpush.bf16.msrb.mxu0 %v2599_v7  ;;  %v2510_v31 = vld [vmem:[%s4132_s4 + $0xc0] sm:$0xf]  ;;  %vm4244_vm12 = vcmask 1041409  }
 0x362   :  { %v2899_v13 = vpop.eup %2898  ;;  %v1257_v16 = vsel %vm4230_vm13, %v2897_v20, %v1256_v14  ;;  %v1239_v19 = vsel %vm823_vm10, %v2897_v20, %v1238_v10  ;;  %v1222_v25 = vsel %vm4232_vm11, %v2897_v20, %v1221_v35  ;;  %v1244_v60 = vsel %vm4239_vm7, %v1235_v49, 0.0  ;;  %vm4240_vm10 = vmmov %vm4239_vm7  ;;  %v2775_v35 = vld [vmem:[%s4132_s4 + $0xc4] sm:$0xf0]  ;;  %v2764_v49 = vld [vmem:[%s4132_s4 + $0x74] sm:$0xf] }
 0x363   :  { %v2901_v32 = vpop.eup %2900  ;;  %v1258_v44 = vsel %vm4233_vm0, %v2899_v13, %v1257_v16  ;;  %v1240_v15 = vsel %vm4234_vm9, %v2899_v13, %v1239_v19  ;;  %v1223_v51 = vsel %vm4235_vm1, %v2899_v13, %v1222_v25  ;;  %1797 = vmatpush.bf16.msra.mxu3 %v2463_v37  ;;  %v2447_v10 = vor.u32 %v2759_v61, %v2446_v48  ;;  %v2472_v25 = vld [vmem:[%s4132_s4 + $0x78] sm:$0xf0]  ;;  %v2771_v61 = vld [vmem:[%s4132_s4 + $0xa4] sm:$0xf0]  ;;  %vm4246_vm0 = vmmov %vm4244_vm12 }
 0x364   :  { %v1259_v24 = vsel %vm4237_vm2, %v2901_v32, %v1258_v44  ;;  %v1241_v53 = vsel %vm4238_vm14, %v2901_v32, %v1240_v15  ;;  %v1227_v47 = vsel %vm4242_vm4, 0.0, %v1223_v51  ;;  %v2511_v19 = vor.u32 %v2775_v35, %v2510_v31  ;;  %v2590_v32 = vld [vmem:[%s4132_s4 + $0x160] sm:$0xf]  ;;  %v2795_v44 = vld [vmem:[%s4132_s4 + $0x164] sm:$0xf0]  ;;  %vm4248_vm1 = vmmov %vm4242_vm4 }
 0x365   :  { %v2861_v56 = vpack.i.bf16 %v1259_v24, %v1252_v40  ;;  %v1245_v42 = vsel %vm4240_vm10, %v1241_v53, 0.0  ;;  %1810 = vmatpush.bf16.msrb.mxu2 %v2527_v45  ;;  %v2475_v62 = vor.u32 %v2764_v49, %v2472_v25  ;;  %v2773_v45 = vld [vmem:[%s4132_s4 + $0xb4] sm:$0xf0]  ;;  %v2760_v31 = vld [vmem:[%s4132_s4 + $0x54] sm:$0xf]  ;;  %vm4243_vm13 = vcmask 1042434   ;;  %vm4252_vm7 = vmmov %vm4246_vm0 }
 0x366   :  { %v1269_v41 = vpack.c.bf16 %v1245_v42, %v1244_v60  ;;  %v2438_v60 = vld [vmem:[%s4132_s4 + $0x30] sm:$0xf]  ;;  %v2757_v42 = vld [vmem:[%s4132_s4 + $0x34] sm:$0xf0]  ;;  %vm4245_vm11 = vcmask 1043459   ;;  %vm4247_vm9 = vmmov %vm4243_vm13 }
 0x367   :  { %2862 = vrot.lane.b32.xlu2 %v2861_v56, %s2990_s26  ;;  %1798 = vmatpush.bf16.msra.mxu3 %v2455_v9  ;;  %v2753_v25 = vld [vmem:[%s4132_s4 + $0x14] sm:$0xf0]  ;;  %vm4249_vm8 = vmmov %vm4247_vm9 }
 0x368   :  { %2411 = vmatmul.msk.bf16.vlgmr.msra.gmra.mxu2 %vm948_vm3, %v1269_v41  ;;  %1835 = vmatpush.bf16.msrb.mxu1 %v2475_v62  ;;  %v2789_v62 = vld [vmem:[%s4132_s4 + $0x134] sm:$0xf0]  ;;  %vm4250_vm2 = vmmov %vm4245_vm11 }
 0x369   :  { %1811 = vmatpush.bf16.msrb.mxu2 %v2519_v33  ;;  %vm4251_vm14 = vmmov %vm4249_vm8 }
 0x36a   :  { %vm4253_vm10 = vmmov %vm4250_vm2 }
 0x36b   :  { %1799 = vmatpush.bf16.msra.mxu3 %v2447_v10  ;;  %vm4254_vm15 = vmmov %vm4246_vm0 }
 0x36c   :  { %vm4255_vm4 = vmmov %vm4249_vm8 }
 0x36d   :  { %1812 = vmatpush.bf16.msrb.mxu2 %v2511_v19 }
 0x3c1   :  { %v2863_v34 = vpop.permute.xlu2 %2862 }
 0x3c2   :  { %v2865_v0 = vunpack.i.h.bf16 %v2863_v34  ;;  %v2864_v1 = vunpack.i.l.bf16 %v2863_v34  ;;  %v2591_v34 = vor.u32 %v2795_v44, %v2590_v32  ;;  %v3799_v32 = vld [vmem:[%s4132_s4 + $0x90] sm:$0xf]  ;;  %v3804_v44 = vld [vmem:[%s4132_s4 + $0x94] sm:$0xf0] }
 0x3c4   :  { %v1266_v4 = vsel %vm948_vm3, %v1226_v23, %v2864_v1  ;;  %v1267_v54 = vsel %vm948_vm3, %v1227_v47, %v2865_v0  ;;  %vm1387_vm3 = vcmask 1041408   ;;  %v2439_v0 = vor.u32 %v2757_v42, %v2438_v60  ;;  %1823 = vmatpush.bf16.msrb.mxu0 %v2591_v34 }
 0x3c5   :  { %v1268_v55 = vpack.c.bf16 %v1267_v54, %v1266_v4 }
 0x3c6   :  { %1800 = vmatpush.bf16.msra.mxu3 %v2439_v0 }
 0x3c7   :  { %1353 = vmatmul.bf16.vlgmr.msra.gmra.mxu1 %v1268_v55 }
 0x3eb   :  { %v1368_v36 = vpop.f32.mrf.mxu2 }
 0x3f3   :  { %v1370_v15 = vpop.f32.mrf.mxu2 }
 0x444   :  { %v1354_v21 = vpop.f32.mrf.mxu1 }
 0x445   :  { %v1369_v6 = vadd.f32 %v1368_v36, %v1354_v21  ;;  %v2762_v36 = vld [vmem:[%s4132_s4 + $0x64] sm:$0xf] }
 0x446   :  { %v2467_v49 = vor.u32 %v2762_v36, %v2464_v28 }
 0x447   :  { %v1375_v26 = vrot.slane %v1369_v6, 2  ;;  %v1376_v50 = vrot.slane %v1369_v6, 4  ;;  %v1377_v43 = vrot.slane %v1369_v6, 6  ;;  %v1388_v58 = vsel %vm1387_vm3, %v1369_v6, -inf  ;;  %v2793_v6 = vld [vmem:[%s4132_s4 + $0x154] sm:$0xf0] }
 0x448   :  { %v1389_v46 = vrot.slane %v1388_v58, 4  ;;  %v2583_v19 = vor.u32 %v2793_v6, %v2582_v18  ;;  %1836 = vmatpush.bf16.msrb.mxu1 %v2467_v49  ;;  %v2756_v18 = vld [vmem:[%s4132_s4 + $0x34] sm:$0xf] }
 0x449   :  { %v1395_v3 = vsel %vm1387_vm3, %v1375_v26, -inf  ;;  %v1402_v11 = vsel %vm1387_vm3, %v1376_v50, -inf  ;;  %v1409_v14 = vsel %vm1387_vm3, %v1377_v43, -inf  ;;  %v2430_v26 = vld [vmem:[%s4132_s4 + $0x20] sm:$0xf] }
 0x44a   :  { %v1390_v20 = vmax.f32 %v1388_v58, %v1389_v46  ;;  %v1396_v2 = vrot.slane %v1395_v3, 4  ;;  %v1403_v13 = vrot.slane %v1402_v11, 4  ;;  %v1410_v16 = vrot.slane %v1409_v14, 4  ;;  %v2755_v50 = vld [vmem:[%s4132_s4 + $0x24] sm:$0xf0]  ;;  %1824 = vmatpush.bf16.msrb.mxu0 %v2583_v19 }
 0x44b   :  { %v2494_v43 = vld [vmem:[%s4132_s4 + $0xa0] sm:$0xf]  ;;  %v2431_v60 = vor.u32 %v2755_v50, %v2430_v26 }
 0x44c   :  { %v1391_v51 = vrot.slane %v1390_v20, 2  ;;  %v1397_v40 = vmax.f32 %v1395_v3, %v1396_v2  ;;  %v1404_v24 = vmax.f32 %v1402_v11, %v1403_v13  ;;  %v1411_v53 = vmax.f32 %v1409_v14, %v1410_v16  ;;  %v1356_v56 = vpop.f32.mrf.mxu1  ;;  %v2456_v3 = vld [vmem:[%s4132_s4 + $0x58] sm:$0xf0]  ;;  %v2791_v2 = vld [vmem:[%s4132_s4 + $0x144] sm:$0xf0] }
 0x44d   :  { %v1371_v41 = vadd.f32 %v1370_v15, %v1356_v56  ;;  %v3791_v13 = vld [vmem:[%s4132_s4 + $0x10] sm:$0xf]  ;;  %v2503_v16 = vor.u32 %v2773_v45, %v2502_v27  ;;  %v2495_v42 = vor.u32 %v2771_v61, %v2494_v43  ;;  %1801 = vmatpush.bf16.msra.mxu3 %v2431_v60  ;;  %v2558_v61 = vld [vmem:[%s4132_s4 + $0x120] sm:$0xf] }
 0x44e   :  { %v1392_v1 = vmax.f32 %v1390_v20, %v1391_v51  ;;  %v1398_v23 = vrot.slane %v1397_v40, 2  ;;  %v1405_v47 = vrot.slane %v1404_v24, 2  ;;  %v1412_v4 = vrot.slane %v1411_v53, 2  ;;  %v2574_v20 = vld [vmem:[%s4132_s4 + $0x140] sm:$0xf] }
 0x44f   :  { %v1378_v54 = vrot.slane %v1371_v41, 2  ;;  %v1379_v55 = vrot.slane %v1371_v41, 4  ;;  %v1380_v57 = vrot.slane %v1371_v41, 6  ;;  %v1416_v22 = vsel %vm1387_vm3, %v1371_v41, -inf  ;;  %1813 = vmatpush.bf16.msrb.mxu2 %v2503_v16  ;;  %v3819_v41 = vld [vmem:[%s4132_s4 + $0x130] sm:$0xf] }
 0x450   :  { %v1393_v12 = vrot.slane %v1392_v1, 1  ;;  %v1399_v63 = vmax.f32 %v1397_v40, %v1398_v23  ;;  %v1406_v8 = vmax.f32 %v1404_v24, %v1405_v47  ;;  %v1413_v5 = vmax.f32 %v1411_v53, %v1412_v4  ;;  %v3809_v24 = vld [vmem:[%s4132_s4 + $0x44] sm:$0xf]  ;;  %v3814_v53 = vld [vmem:[%s4132_s4 + $0x48] sm:$0xf0] }
 0x451   :  { %v1417_v59 = vrot.slane %v1416_v22, 4  ;;  %v1423_v29 = vsel %vm1387_vm3, %v1378_v54, -inf  ;;  %v1430_v37 = vsel %vm1387_vm3, %v1379_v55, -inf  ;;  %v1437_v39 = vsel %vm1387_vm3, %v1380_v57, -inf  ;;  %v3827_v47 = vld [vmem:[%s4132_s4] sm:$0xf] }
 0x452   :  { %v1394_v30 = vmax.f32 %v1392_v1, %v1393_v12  ;;  %v1400_v21 = vrot.slane %v1399_v63, 1  ;;  %v1407_v9 = vrot.slane %v1406_v8, 1  ;;  %v1414_v38 = vrot.slane %v1413_v5, 1  ;;  %v3832_v4 = vld [vmem:[%s4132_s4 + $0x4] sm:$0xf0] }
 0x453   :  { %v1418_v33 = vmax.f32 %v1416_v22, %v1417_v59  ;;  %v1424_v52 = vrot.slane %v1423_v29, 4  ;;  %v1431_v17 = vrot.slane %v1430_v37, 4  ;;  %v1438_v7 = vrot.slane %v1437_v39, 4  ;;  %1814 = vmatpush.bf16.msrb.mxu2 %v2495_v42  ;;  %v2528_v16 = vld [vmem:[%s4132_s4 + $0xe8] sm:$0xf0] }
 0x454   :  { %v1401_v58 = vmax.f32 %v1399_v63, %v1400_v21  ;;  %v1408_v48 = vmax.f32 %v1406_v8, %v1407_v9  ;;  %v1415_v46 = vmax.f32 %v1413_v5, %v1414_v38  ;;  %2902 = vtanh.f32 %v1394_v30  ;;  %v3840_v63 = vld [vmem:[%s4132_s4 + $0x80] sm:$0xf]  ;;  %v3845_v8 = vld [vmem:[%s4132_s4 + $0x84] sm:$0xf0]  ;;  %v2440_v30 = vld [vmem:[%s4132_s4 + $0x38] sm:$0xf0] }
 0x455   :  { %v1419_v11 = vrot.slane %v1418_v33, 2  ;;  %v1425_v14 = vmax.f32 %v1423_v29, %v1424_v52  ;;  %v1432_v10 = vmax.f32 %v1430_v37, %v1431_v17  ;;  %v1439_v35 = vmax.f32 %v1437_v39, %v1438_v7  ;;  %v2780_v52 = vld [vmem:[%s4132_s4 + $0xf4] sm:$0xf]  ;;  %v2536_v17 = vld [vmem:[%s4132_s4 + $0xf8] sm:$0xf0] }
 0x456   :  { %2904 = vtanh.f32 %v1401_v58  ;;  %v2459_v23 = vor.u32 %v2760_v31, %v2456_v3  ;;  %v2575_v57 = vor.u32 %v2791_v2, %v2574_v20  ;;  %v2423_v22 = vor.u32 %v2753_v25, %v3791_v13  ;;  %v2796_v7 = vld [vmem:[%s4132_s4 + $0x174] sm:$0xf]  ;;  %v2787_v31 = vld [vmem:[%s4132_s4 + $0x124] sm:$0xf0]  ;;  %v2778_v13 = vld [vmem:[%s4132_s4 + $0xe4] sm:$0xf] }
 0x457   :  { %2906 = vtanh.f32 %v1408_v48  ;;  %v1420_v15 = vmax.f32 %v1418_v33, %v1419_v11  ;;  %v1426_v51 = vrot.slane %v1425_v14, 2  ;;  %v1433_v40 = vrot.slane %v1432_v10, 2  ;;  %v2424_v42 = vld [vmem:[%s4132_s4 + $0x18] sm:$0xf0] }
 0x458   :  { %2908 = vtanh.f32 %v1415_v46  ;;  %v1440_v56 = vrot.slane %v1439_v35, 2  ;;  %v2487_v12 = vor.u32 %v3804_v44, %v3799_v32  ;;  %v2451_v37 = vor.u32 %v3809_v24, %v3814_v53  ;;  %1837 = vmatpush.bf16.msrb.mxu1 %v2459_v23  ;;  %1825 = vmatpush.bf16.msrb.mxu0 %v2575_v57  ;;  %v2600_v46 = vld [vmem:[%s4132_s4 + $0x178] sm:$0xf0]  ;;  %v2432_v32 = vld [vmem:[%s4132_s4 + $0x28] sm:$0xf0] }
 0x459   :  { %v1421_v34 = vrot.slane %v1420_v15, 1  ;;  %v1427_v0 = vmax.f32 %v1425_v14, %v1426_v51  ;;  %v1434_v1 = vmax.f32 %v1432_v10, %v1433_v40  ;;  %v2567_v45 = vor.u32 %v2789_v62, %v3819_v41  ;;  %1802 = vmatpush.bf16.msra.mxu3 %v2423_v22  ;;  %v2754_v10 = vld [vmem:[%s4132_s4 + $0x24] sm:$0xf]  ;;  %v2592_v51 = vld [vmem:[%s4132_s4 + $0x168] sm:$0xf0] }
 0x45a   :  { %v2903_v54 = vpop.eup %2902  ;;  %v1441_v55 = vmax.f32 %v1439_v35, %v1440_v56  ;;  %v2415_v36 = vor.u32 %v3832_v4, %v3827_v47  ;;  %v2479_v28 = vor.u32 %v3845_v8, %v3840_v63  ;;  %1815 = vmatpush.bf16.msrb.mxu2 %v2487_v12  ;;  %v2443_v2 = vor.u32 %v2756_v18, %v2440_v30  ;;  %v2794_v44 = vld [vmem:[%s4132_s4 + $0x164] sm:$0xf]  ;;  %v2550_v40 = vld [vmem:[%s4132_s4 + $0x110] sm:$0xf]  ;;  %v2785_v24 = vld [vmem:[%s4132_s4 + $0x114] sm:$0xf0] }
 0x45b   :  { %v1422_v5 = vmax.f32 %v1420_v15, %v1421_v34  ;;  %v1428_v59 = vrot.slane %v1427_v0, 1  ;;  %v1435_v29 = vrot.slane %v1434_v1, 1  ;;  %v2539_v49 = vor.u32 %v2780_v52, %v2536_v17  ;;  %v2752_v56 = vld [vmem:[%s4132_s4 + $0x14] sm:$0xf]  ;;  %v2520_v62 = vld [vmem:[%s4132_s4 + $0xd8] sm:$0xf0] }
 0x45c   :  { %v2905_v39 = vpop.eup %2904  ;;  %v1442_v27 = vrot.slane %v1441_v55, 1  ;;  %1838 = vmatpush.bf16.msrb.mxu1 %v2451_v37  ;;  %1826 = vmatpush.bf16.msrb.mxu0 %v2567_v45  ;;  %v2603_v19 = vor.u32 %v2796_v7, %v2600_v46  ;;  %v2559_v25 = vor.u32 %v2787_v31, %v2558_v61  ;;  %v2531_v53 = vor.u32 %v2778_v13, %v2528_v16  ;;  %v2776_v41 = vld [vmem:[%s4132_s4 + $0xd4] sm:$0xf]  ;;  %v2584_v47 = vld [vmem:[%s4132_s4 + $0x158] sm:$0xf0] }
 0x45d   :  { %v2907_v21 = vpop.eup %2906  ;;  %v1506_v9 = vsel %vm4243_vm13, %v2905_v39, %v2903_v54  ;;  %v1525_v38 = vsel %vm4244_vm12, %v2905_v39, %v2903_v54  ;;  %v1429_v6 = vmax.f32 %v1427_v0, %v1428_v59  ;;  %v1436_v33 = vmax.f32 %v1434_v1, %v1435_v29  ;;  %1803 = vmatpush.bf16.msra.mxu3 %v2415_v36  ;;  %v2792_v23 = vld [vmem:[%s4132_s4 + $0x154] sm:$0xf]  ;;  %v2542_v54 = vld [vmem:[%s4132_s4 + $0x100] sm:$0xf]  ;;  %v2512_v45 = vld [vmem:[%s4132_s4 + $0xc8] sm:$0xf0] }
 0x45e   :  { %v2909_v26 = vpop.eup %2908  ;;  %v1507_v50 = vsel %vm4245_vm11, %v2907_v21, %v1506_v9  ;;  %v1516_v43 = vsel %vm4246_vm0, %v2907_v21, %v2905_v39  ;;  %v1526_v58 = vsel %vm4247_vm9, %v2907_v21, %v1525_v38  ;;  %v1443_v48 = vmax.f32 %v1441_v55, %v1442_v27  ;;  %1816 = vmatpush.bf16.msrb.mxu2 %v2479_v28  ;;  %v2783_v55 = vld [vmem:[%s4132_s4 + $0x104] sm:$0xf0]  ;;  %v2774_v27 = vld [vmem:[%s4132_s4 + $0xc4] sm:$0xf]  ;;  %vm4256_vm13 = vmmov %vm4255_vm4 }
 0x45f   :  { %v1512_v3 = vsel %vm4248_vm1, 0.0, %v1507_v50  ;;  %v1517_v11 = vsel %vm4249_vm8, %v2909_v26, %v1516_v43  ;;  %v1527_v14 = vsel %vm4250_vm2, %v2909_v26, %v1526_v58  ;;  %2910 = vtanh.f32 %v1422_v5  ;;  %vm4257_vm12 = vmmov %vm4250_vm2  ;;  %v2750_v30 = vld [vmem:[%s4132_s4 + $0x4] sm:$0xf]  ;;  %v2416_v21 = vld [vmem:[%s4132_s4 + $0x8] sm:$0xf0] }
 0x460   :  { %v1523_v35 = vsel %vm1522_vm5, %v1517_v11, 0.0  ;;  %v1535_v20 = vrot.slane %v1527_v14, 4  ;;  %2912 = vtanh.f32 %v1429_v6  ;;  %1839 = vmatpush.bf16.msrb.mxu1 %v2443_v2  ;;  %v2435_v60 = vor.u32 %v2754_v10, %v2432_v32  ;;  %1827 = vmatpush.bf16.msrb.mxu0 %v2559_v25  ;;  %v2790_v6 = vld [vmem:[%s4132_s4 + $0x144] sm:$0xf]  ;;  %vm4258_vm11 = vmmov %vm4248_vm1  ;;  %v2772_v50 = vld [vmem:[%s4132_s4 + $0xb4] sm:$0xf] }
 0x461   :  { %1544 = vst [vmem:[#allocation1 + $0x10] ss:$2 sm:$0xff] %v1523_v35  ;;  %2914 = vtanh.f32 %v1436_v33  ;;  %1848 = vmatpush.bf16.msrb.mxu3 %v2539_v49  ;;  %v2595_v0 = vor.u32 %v2794_v44, %v2592_v51  ;;  %v2551_v1 = vor.u32 %v2785_v24, %v2550_v40  ;;  %v2427_v63 = vor.u32 %v2752_v56, %v2424_v42  ;;  %v2576_v33 = vld [vmem:[%s4132_s4 + $0x148] sm:$0xf0]  ;;  %v2504_v43 = vld [vmem:[%s4132_s4 + $0xb8] sm:$0xf0] }
 0x462   :  { %v1538_v15 = vsel %vm1537_vm6, %v1512_v3, %v1535_v20  ;;  %2916 = vtanh.f32 %v1443_v48  ;;  %1861 = vmatpush.bf16.msra.mxu2 %v2603_v19  ;;  %v2523_v8 = vor.u32 %v2776_v41, %v2520_v62  ;;  %v2587_v39 = vor.u32 %v2792_v23, %v2584_v47  ;;  %v2788_v48 = vld [vmem:[%s4132_s4 + $0x134] sm:$0xf]  ;;  %v2568_v46 = vld [vmem:[%s4132_s4 + $0x138] sm:$0xf0]  ;;  %v2770_v3 = vld [vmem:[%s4132_s4 + $0xa4] sm:$0xf] }
 0x463   :  { %1540 = vst [vmem:[#allocation1] ss:$2 sm:$0xff] %v1538_v15  ;;  %v2543_v18 = vor.u32 %v2783_v55, %v2542_v54  ;;  %v2515_v17 = vor.u32 %v2774_v27, %v2512_v45  ;;  %v2419_v26 = vor.u32 %v2750_v30, %v2416_v21  ;;  %v2579_v58 = vor.u32 %v2790_v6, %v2576_v33  ;;  %v2496_v11 = vld [vmem:[%s4132_s4 + $0xa8] sm:$0xf0]  ;;  %v2786_v14 = vld [vmem:[%s4132_s4 + $0x124] sm:$0xf] }
 0x464   :  { %1840 = vmatpush.bf16.msrb.mxu1 %v2435_v60  ;;  %1828 = vmatpush.bf16.msrb.mxu0 %v2551_v1  ;;  %v2507_v61 = vor.u32 %v2772_v50, %v2504_v43  ;;  %v2571_v31 = vor.u32 %v2788_v48, %v2568_v46  ;;  %v2560_v35 = vld [vmem:[%s4132_s4 + $0x128] sm:$0xf0]  ;;  %v2499_v16 = vor.u32 %v2770_v3, %v2496_v11  ;;  %v2768_v32 = vld [vmem:[%s4132_s4 + $0x94] sm:$0xf]  ;;  %v2488_v44 = vld [vmem:[%s4132_s4 + $0x98] sm:$0xf0] }
 0x465   :  { %v2911_v34 = vpop.eup %2910  ;;  %1849 = vmatpush.bf16.msrb.mxu3 %v2531_v53  ;;  %v2563_v25 = vor.u32 %v2786_v14, %v2560_v35  ;;  %v2784_v15 = vld [vmem:[%s4132_s4 + $0x114] sm:$0xf]  ;;  %v2552_v51 = vld [vmem:[%s4132_s4 + $0x118] sm:$0xf0]  ;;  %v2491_v40 = vor.u32 %v2768_v32, %v2488_v44  ;;  %v2766_v53 = vld [vmem:[%s4132_s4 + $0x84] sm:$0xf] }
 0x466   :  { %v2913_v4 = vpop.eup %2912  ;;  %1862 = vmatpush.bf16.msra.mxu2 %v2595_v0  ;;  %v2555_v24 = vor.u32 %v2784_v15, %v2552_v51  ;;  %v2480_v56 = vld [vmem:[%s4132_s4 + $0x88] sm:$0xf0]  ;;  %v2782_v60 = vld [vmem:[%s4132_s4 + $0x104] sm:$0xf]  ;;  %v2813_v54 = vld [vmem:[%s4133_s5 + $0x78] sm:$0xff]  ;;  %vm1884_vm0 = vcmask 1045504  }
 0x467   :  { %v2915_v57 = vpop.eup %2914  ;;  %v1508_v22 = vsel %vm4251_vm14, %v2913_v4, %v2911_v34  ;;  %v1528_v12 = vsel %vm4252_vm7, %v2913_v4, %v2911_v34  ;;  %v2544_v42 = vld [vmem:[%s4132_s4 + $0x108] sm:$0xf0]  ;;  %v2483_v41 = vor.u32 %v2766_v53, %v2480_v56  ;;  %v2821_v55 = vld [vmem:[%s4133_s5 + $0xb8] sm:$0xff]  ;;  %v2826_v30 = vld [vmem:[%s4133_s5 + $0xe0] sm:$0xff]  ;;  %vm4263_vm2 = vcmask 254976  }
 0x468   :  { %v2917_v5 = vpop.eup %2916  ;;  %v1509_v59 = vsel %vm4253_vm10, %v2915_v57, %v1508_v22  ;;  %v1518_v29 = vsel %vm4254_vm15, %v2915_v57, %v2913_v4  ;;  %v1529_v37 = vsel %vm4255_vm4, %v2915_v57, %v1528_v12  ;;  %1841 = vmatpush.bf16.msrb.mxu1 %v2427_v63  ;;  %1829 = vmatpush.bf16.msrb.mxu0 %v2543_v18  ;;  %v2805_v4 = vld [vmem:[%s4133_s5 + $0x38] sm:$0xff]  ;;  %v2804_v12 = vld [vmem:[%s4133_s5 + $0x30] sm:$0xff]  ;;  %v2819_v27 = vld [vmem:[%s4133_s5 + $0xa8] sm:$0xff] }
 0x469   :  { %v1519_v36 = vsel %vm4256_vm13, %v2917_v5, %v1518_v29  ;;  %v1530_v28 = vsel %vm4257_vm12, %v2917_v5, %v1529_v37  ;;  %v1513_v52 = vsel %vm4258_vm11, 0.0, %v1509_v59  ;;  %1850 = vmatpush.bf16.msrb.mxu3 %v2523_v8  ;;  %v2547_v62 = vor.u32 %v2782_v60, %v2544_v42  ;;  %v2829_v22 = vld [vmem:[%s4133_s5 + $0xf8] sm:$0xff]  ;;  %v2812_v63 = vld [vmem:[%s4133_s5 + $0x70] sm:$0xff]  ;;  %v2803_v29 = vld [vmem:[%s4133_s5 + $0x28] sm:$0xff] }
 0x46a   :  { %v1524_v9 = vsel %vm1522_vm5, %v1519_v36, 0.0  ;;  %v1536_v38 = vrot.slane %v1530_v28, 4  ;;  %1863 = vmatpush.bf16.msra.mxu2 %v2587_v39  ;;  %v2820_v8 = vld [vmem:[%s4133_s5 + $0xb0] sm:$0xff]  ;;  %v2811_v37 = vld [vmem:[%s4133_s5 + $0x68] sm:$0xff]  ;;  %v2802_v36 = vld [vmem:[%s4133_s5 + $0x20] sm:$0xff]  ;;  %vm1878_vm5 = vcmask 1043458  }
 0x46b   :  { %1546 = vst [vmem:[#allocation1 + $0x11] ss:$2 sm:$0xff] %v1524_v9  ;;  %v2828_v5 = vld [vmem:[%s4133_s5 + $0xf0] sm:$0xff]  ;;  %v2827_v45 = vld [vmem:[%s4133_s5 + $0xe8] sm:$0xff]  ;;  %v2810_v28 = vld [vmem:[%s4133_s5 + $0x60] sm:$0xff] }
 0x46c   :  { %v1539_v7 = vsel %vm1537_vm6, %v1513_v52, %v1536_v38  ;;  %1842 = vmatpush.bf16.msrb.mxu1 %v2419_v26  ;;  %2154 = vmatpush.bf16.msra.mxu0 %v2821_v55  ;;  %v2818_v18 = vld [vmem:[%s4133_s5 + $0xa0] sm:$0xff]  ;;  %v2801_v9 = vld [vmem:[%s4133_s5 + $0x18] sm:$0xff]  ;;  %v2800_v50 = vld [vmem:[%s4133_s5 + $0x10] sm:$0xff]  ;;  %vm1881_vm6 = vcmask 1045508  }
 0x46d   :  { %1542 = vst [vmem:[#allocation1 + $0x1] ss:$2 sm:$0xff] %v1539_v7  ;;  %1851 = vmatpush.bf16.msrb.mxu3 %v2515_v17  ;;  %v2809_v38 = vld [vmem:[%s4133_s5 + $0x58] sm:$0xff]  ;;  %v2808_v43 = vld [vmem:[%s4133_s5 + $0x50] sm:$0xff]  ;;  %v2807_v35 = vld [vmem:[%s4133_s5 + $0x48] sm:$0xff] }
 0x46e   :  { %1864 = vmatpush.bf16.msra.mxu2 %v2579_v58  ;;  %v2817_v17 = vld [vmem:[%s4133_s5 + $0x98] sm:$0xff]  ;;  %v2816_v46 = vld [vmem:[%s4133_s5 + $0x90] sm:$0xff]  ;;  %v2814_v32 = vld [vmem:[%s4133_s5 + $0x80] sm:$0xff] }
 0x46f   :  { %v2825_v7 = vld [vmem:[%s4133_s5 + $0xd8] sm:$0xff]  ;;  %v2822_v44 = vld [vmem:[%s4133_s5 + $0xc0] sm:$0xff] }
 0x470   :  { %2167 = vmatpush.bf16.msra.mxu1 %v2829_v22  ;;  %2155 = vmatpush.bf16.msra.mxu0 %v2820_v8 }
 0x471   :  { %1852 = vmatpush.bf16.msrb.mxu3 %v2507_v61  ;;  %v2824_v61 = vld [vmem:[%s4133_s5 + $0xd0] sm:$0xff] }
 0x472   :  { %v1549_v10 = vld.sshfl [vmem:[#allocation1 + $0x10] sm:$0xff pattern:$0x75316420]  ;;  %1865 = vmatpush.bf16.msra.mxu2 %v2571_v31 }
 0x473   :  { %v1555_v20 = vpack.c.bf16 %v1549_v10, %v1549_v10  ;;  %v2799_v10 = vld [vmem:[%s4133_s5 + $0x8] sm:$0xff] }
 0x474   :  { %v1547_v2 = vld.sshfl [vmem:[#allocation1] sm:$0xff pattern:$0x75316420]  ;;  %v1548_v13 = vld.sshfl [vmem:[#allocation1 + $0x8] sm:$0xff pattern:$0x75316420]  ;;  %2168 = vmatpush.bf16.msra.mxu1 %v2828_v5  ;;  %2156 = vmatpush.bf16.msra.mxu0 %v2819_v27 }
 0x475   :  { %1830 = vmatmul.bf16.vlgmr.msrb.gmra.mxu0 %v1555_v20  ;;  %v1553_v49 = vpack.c.bf16 %v1547_v2, %v1547_v2  ;;  %v1554_v19 = vpack.c.bf16 %v1548_v13, %v1548_v13  ;;  %1853 = vmatpush.bf16.msrb.mxu3 %v2499_v16  ;;  %v2815_v2 = vld [vmem:[%s4133_s5 + $0x88] sm:$0xff] }
 0x476   :  { %1866 = vmatpush.bf16.msra.mxu2 %v2563_v25  ;;  %v2823_v13 = vld [vmem:[%s4133_s5 + $0xc8] sm:$0xff] }
 0x477   :  { %1804 = vmatmul.bf16.vlgmr.msra.gmra.mxu3 %v1553_v49  ;;  %1817 = vmatmul.bf16.vlgmr.msrb.gmra.mxu2 %v1554_v19 }
 0x478   :  { %1843 = vmatmul.bf16.vlgmr.msrb.gmra.mxu1 %v1553_v49  ;;  %2157 = vmatpush.bf16.msra.mxu0 %v2818_v18  ;;  %v2798_v49 = vld [vmem:[%s4133_s5] sm:$0xff] }
 0x479   :  { %1854 = vmatpush.bf16.msrb.mxu3 %v2491_v40  ;;  %2169 = vmatpush.bf16.msra.mxu1 %v2827_v45 }
 0x47a   :  { %1867 = vmatpush.bf16.msra.mxu2 %v2555_v24 }
 0x47c   :  { %2158 = vmatpush.bf16.msra.mxu0 %v2817_v17 }
 0x47d   :  { %1855 = vmatpush.bf16.msrb.mxu3 %v2483_v41  ;;  %2170 = vmatpush.bf16.msra.mxu1 %v2826_v30 }
 0x47e   :  { %1868 = vmatpush.bf16.msra.mxu2 %v2547_v62 }
 0x480   :  { %2159 = vmatpush.bf16.msra.mxu0 %v2816_v46 }
 0x481   :  { %2290 = vmatpush.bf16.msra.mxu3 %v2805_v4  ;;  %2171 = vmatpush.bf16.msra.mxu1 %v2825_v7 }
 0x482   :  { %2303 = vmatpush.bf16.msrb.mxu2 %v2813_v54 }
 0x484   :  { %2160 = vmatpush.bf16.msra.mxu0 %v2815_v2 }
 0x485   :  { %2291 = vmatpush.bf16.msra.mxu3 %v2804_v12  ;;  %2172 = vmatpush.bf16.msra.mxu1 %v2824_v61 }
 0x486   :  { %2304 = vmatpush.bf16.msrb.mxu2 %v2812_v63 }
 0x487   :  { %1856 = vmatmul.bf16.vlgmr.msrb.gmra.mxu3 %v1554_v19  ;;  %1869 = vmatmul.bf16.vlgmr.msra.gmra.mxu2 %v1555_v20  ;;  %v2806_v19 = vld [vmem:[%s4133_s5 + $0x40] sm:$0xff] }
 0x488   :  { %2161 = vmatpush.bf16.msra.mxu0 %v2814_v32 }
 0x489   :  { %2292 = vmatpush.bf16.msra.mxu3 %v2803_v29  ;;  %2173 = vmatpush.bf16.msra.mxu1 %v2823_v13 }
 0x48a   :  { %2305 = vmatpush.bf16.msrb.mxu2 %v2811_v37 }
 0x48d   :  { %2293 = vmatpush.bf16.msra.mxu3 %v2802_v36  ;;  %2174 = vmatpush.bf16.msra.mxu1 %v2822_v44 }
 0x48e   :  { %2306 = vmatpush.bf16.msrb.mxu2 %v2810_v28 }
 0x491   :  { %2294 = vmatpush.bf16.msra.mxu3 %v2801_v9 }
 0x492   :  { %2307 = vmatpush.bf16.msrb.mxu2 %v2809_v38 }
 0x495   :  { %2295 = vmatpush.bf16.msra.mxu3 %v2800_v50 }
 0x496   :  { %2308 = vmatpush.bf16.msrb.mxu2 %v2808_v43 }
 0x499   :  { %2296 = vmatpush.bf16.msra.mxu3 %v2799_v10 }
 0x49a   :  { %2309 = vmatpush.bf16.msrb.mxu2 %v2807_v35 }
 0x49d   :  { %2297 = vmatpush.bf16.msra.mxu3 %v2798_v49 }
 0x49e   :  { %2310 = vmatpush.bf16.msrb.mxu2 %v2806_v19 }
 0x4f2   :  { %v1831_v34 = vpop.f32.mrf.mxu0 }
 0x4f5   :  { %v1844_v0 = vpop.f32.mrf.mxu1 }
 0x4fa   :  { %v1833_v1 = vpop.f32.mrf.mxu0  ;;  %v1805_v23 = vpop.f32.mrf.mxu3 }
 0x4fb   :  { %v1818_v47 = vpop.f32.mrf.mxu2 }
 0x4fc   :  { %v1819_v6 = vadd.f32 %v1818_v47, %v1805_v23 }
 0x4fd   :  { %v1846_v57 = vpop.f32.mrf.mxu1 }
 0x4fe   :  { %v1832_v58 = vadd.f32 %v1831_v34, %v1819_v6 }
 0x502   :  { %v1807_v59 = vpop.f32.mrf.mxu3 }
 0x503   :  { %v1820_v39 = vpop.f32.mrf.mxu2 }
 0x50a   :  { %v1857_v21 = vpop.f32.mrf.mxu3 }
 0x50b   :  { %v1858_v33 = vadd.f32 %v1857_v21, %v1844_v0  ;;  %v1870_v52 = vpop.f32.mrf.mxu2 }
 0x50d   :  { %v1871_v26 = vadd.f32 %v1870_v52, %v1858_v33 }
 0x50f   :  { %v1876_v48 = vrot.slane %v1871_v26, 6 }
 0x511   :  { %v1877_v31 = vsel %vm1387_vm3, %v1832_v58, %v1876_v48  ;;  %v1879_v3 = vsel %vm1878_vm5, %v1832_v58, %v1876_v48  ;;  %v1882_v16 = vsel %vm1881_vm6, %v1832_v58, %v1876_v48  ;;  %v1885_v25 = vsel %vm1884_vm0, %v1876_v48, %v1832_v58 }
 0x512   :  { %v1880_v11 = vrot.slane %v1879_v3, 2  ;;  %1887 = vst [vmem:[#allocation1] ss:$4 sm:$0xff] %v1877_v31  ;;  %v1859_v14 = vpop.f32.mrf.mxu3  ;;  %v1883_v15 = vrot.slane %v1882_v16, 4  ;;  %v1886_v24 = vrot.slane %v1885_v25, 6 }
 0x513   :  { %v1872_v20 = vpop.f32.mrf.mxu2 }
 0x514   :  { %1891 = vst [vmem:[#allocation1 + $0x20] ss:$4 sm:$0xff] %v1880_v11 }
 0x519   :  { %v1888_v51 = vld.sshfl [vmem:[#allocation1] sm:$0xff pattern:$0x73625140]  ;;  %v1889_v40 = vld.sshfl [vmem:[#allocation1 + $0x8] sm:$0xff pattern:$0x73625140] }
 0x51a   :  { %1894 = vst [vmem:[#allocation1] ss:$4 sm:$0xff] %v1883_v15  ;;  %v1908_v53 = vsel %vm1387_vm3, %v1888_v51, -inf  ;;  %v1915_v56 = vsel %vm1387_vm3, %v1889_v40, -inf }
 0x51b   :  { %v1892_v60 = vld.sshfl [vmem:[#allocation1 + $0x20] sm:$0xff pattern:$0x73625140]  ;;  %v1893_v42 = vld.sshfl [vmem:[#allocation1 + $0x28] sm:$0xff pattern:$0x73625140] }
 0x51c   :  { %1897 = vst [vmem:[#allocation1 + $0x20] ss:$4 sm:$0xff] %v1886_v24  ;;  %v1909_v41 = vrot.slane %v1908_v53, 4  ;;  %v1916_v62 = vrot.slane %v1915_v56, 4  ;;  %v1922_v34 = vsel %vm1387_vm3, %v1892_v60, -inf  ;;  %v1929_v0 = vsel %vm1387_vm3, %v1893_v42, -inf }
 0x51d   :  { %v1923_v1 = vrot.slane %v1922_v34, 4  ;;  %v1930_v23 = vrot.slane %v1929_v0, 4 }
 0x51e   :  { %v1910_v47 = vmax.f32 %v1908_v53, %v1909_v41  ;;  %v1917_v4 = vmax.f32 %v1915_v56, %v1916_v62 }
 0x51f   :  { %v1924_v54 = vmax.f32 %v1922_v34, %v1923_v1  ;;  %v1931_v63 = vmax.f32 %v1929_v0, %v1930_v23 }
 0x520   :  { %v1911_v55 = vrot.slane %v1910_v47, 2  ;;  %v1918_v57 = vrot.slane %v1917_v4, 2 }
 0x521   :  { %v1895_v22 = vld.sshfl [vmem:[#allocation1] sm:$0xff pattern:$0x73625140]  ;;  %v1896_v12 = vld.sshfl [vmem:[#allocation1 + $0x8] sm:$0xff pattern:$0x73625140] }
 0x522   :  { %v1912_v8 = vmax.f32 %v1910_v47, %v1911_v55  ;;  %v1936_v5 = vsel %vm1387_vm3, %v1895_v22, -inf  ;;  %v1919_v59 = vmax.f32 %v1917_v4, %v1918_v57  ;;  %v1943_v29 = vsel %vm1387_vm3, %v1896_v12, -inf }
 0x523   :  { %v1937_v37 = vrot.slane %v1936_v5, 4  ;;  %v1944_v39 = vrot.slane %v1943_v29, 4  ;;  %v1898_v27 = vld.sshfl [vmem:[#allocation1 + $0x20] sm:$0xff pattern:$0x73625140]  ;;  %v1925_v45 = vrot.slane %v1924_v54, 2 }
 0x524   :  { %v1913_v36 = vrot.slane %v1912_v8, 1  ;;  %v1920_v28 = vrot.slane %v1919_v59, 1  ;;  %v1950_v18 = vsel %vm1387_vm3, %v1898_v27, -inf  ;;  %v1899_v30 = vld.sshfl [vmem:[#allocation1 + $0x28] sm:$0xff pattern:$0x73625140] }
 0x525   :  { %v1938_v21 = vmax.f32 %v1936_v5, %v1937_v37  ;;  %v1945_v9 = vmax.f32 %v1943_v29, %v1944_v39  ;;  %v1926_v38 = vmax.f32 %v1924_v54, %v1925_v45  ;;  %v1951_v6 = vrot.slane %v1950_v18, 4 }
 0x526   :  { %v1914_v33 = vmax.f32 %v1912_v8, %v1913_v36  ;;  %v1932_v52 = vrot.slane %v1931_v63, 2  ;;  %v1957_v17 = vsel %vm1387_vm3, %v1899_v30, -inf  ;;  %v1921_v58 = vmax.f32 %v1919_v59, %v1920_v28  ;;  %vm4259_vm3 = vmmov %vm4252_vm7 }
 0x527   :  { %v1939_v7 = vrot.slane %v1938_v21, 2  ;;  %v1946_v26 = vrot.slane %v1945_v9, 2  ;;  %v1927_v50 = vrot.slane %v1926_v38, 1  ;;  %v1952_v43 = vmax.f32 %v1950_v18, %v1951_v6  ;;  %vm4260_vm9 = vmmov %vm4259_vm3 }
 0x528   :  { %v1933_v48 = vmax.f32 %v1931_v63, %v1932_v52  ;;  %v1958_v46 = vrot.slane %v1957_v17, 4  ;;  %2918 = vtanh.f32 %v1914_v33  ;;  %vm4261_vm1 = vmmov %vm4259_vm3 }
 0x529   :  { %v1940_v61 = vmax.f32 %v1938_v21, %v1939_v7  ;;  %v1947_v31 = vmax.f32 %v1945_v9, %v1946_v26  ;;  %v1928_v3 = vmax.f32 %v1926_v38, %v1927_v50  ;;  %v1953_v11 = vrot.slane %v1952_v43, 2  ;;  %vm4262_vm8 = vmmov %vm4261_vm1 }
 0x52a   :  { %v1934_v14 = vrot.slane %v1933_v48, 1  ;;  %v1959_v10 = vmax.f32 %v1957_v17, %v1958_v46  ;;  %2920 = vtanh.f32 %v1921_v58  ;;  %v2936_v17 = vld [vmem:[%s4129_s1] sm:$0x3f] }
 0x52b   :  { %v1941_v35 = vrot.slane %v1940_v61, 1  ;;  %v1948_v20 = vrot.slane %v1947_v31, 1  ;;  %v1954_v2 = vmax.f32 %v1952_v43, %v1953_v11  ;;  %2922 = vtanh.f32 %v1928_v3 }
 0x52c   :  { %v1935_v13 = vmax.f32 %v1933_v48, %v1934_v14  ;;  %v1960_v16 = vrot.slane %v1959_v10, 2  ;;  %v2316_v7 = vperm.slane %v2936_v17, 5 }
 0x52d   :  { %v1942_v49 = vmax.f32 %v1940_v61, %v1941_v35  ;;  %v1949_v19 = vmax.f32 %v1947_v31, %v1948_v20  ;;  %v1955_v25 = vrot.slane %v1954_v2, 1 }
 0x52e   :  { %v1961_v32 = vmax.f32 %v1959_v10, %v1960_v16  ;;  %2924 = vtanh.f32 %v1935_v13  ;;  %v2919_v51 = vpop.eup %2918 }
 0x52f   :  { %2926 = vtanh.f32 %v1942_v49  ;;  %v1956_v44 = vmax.f32 %v1954_v2, %v1955_v25  ;;  %v2036_v60 = vpack.c.bf16 %v2919_v51, %v2919_v51 }
 0x530   :  { %2928 = vtanh.f32 %v1949_v19  ;;  %v1962_v15 = vrot.slane %v1961_v32, 1  ;;  %v2921_v40 = vpop.eup %2920 }
 0x531   :  { %2930 = vtanh.f32 %v1956_v44  ;;  %v2923_v53 = vpop.eup %2922  ;;  %v2037_v41 = vpack.c.bf16 %v2921_v40, %v2921_v40  ;;  %v2184_v47 = vunpack.c.l.b16 %v2036_v60 }
 0x532   :  { %v1963_v24 = vmax.f32 %v1961_v32, %v1962_v15  ;;  %v2040_v0 = vpack.c.bf16 %v2923_v53, %v2923_v53 }
 0x533   :  { %v2185_v54 = vunpack.c.l.b16 %v2037_v41 }
 0x534   :  { %v2925_v56 = vpop.eup %2924  ;;  %2932 = vtanh.f32 %v1963_v24  ;;  %v2048_v8 = vunpack.c.l.b16 %v2040_v0 }
 0x535   :  { %v2927_v42 = vpop.eup %2926  ;;  %v2041_v22 = vpack.c.bf16 %v2925_v56, %v2925_v56 }
 0x536   :  { %v2929_v62 = vpop.eup %2928  ;;  %v2038_v34 = vpack.c.bf16 %v2927_v42, %v2927_v42 }
 0x537   :  { %v2039_v1 = vpack.c.bf16 %v2929_v62, %v2929_v62  ;;  %v2931_v23 = vpop.eup %2930  ;;  %v2049_v45 = vunpack.c.l.b16 %v2041_v22 }
 0x538   :  { %v2186_v4 = vunpack.c.l.b16 %v2038_v34  ;;  %v2042_v57 = vpack.c.bf16 %v2931_v23, %v2931_v23 }
 0x539   :  { %v2187_v55 = vunpack.c.l.b16 %v2039_v1 }
 0x53a   :  { %v2933_v12 = vpop.eup %2932  ;;  %v2188_v63 = vsel %vm4259_vm3, %v2186_v4, %v2184_v47  ;;  %v2050_v29 = vunpack.c.l.b16 %v2042_v57 }
 0x53b   :  { %v2190_v5 = vpack.c.b16 %v2188_v63, %v2188_v63  ;;  %v2189_v59 = vsel %vm4260_vm9, %v2187_v55, %v2185_v54  ;;  %v2043_v37 = vpack.c.bf16 %v2933_v12, %v2933_v12 }
 0x53c   :  { %v2191_v39 = vpack.c.b16 %v2189_v59, %v2189_v59  ;;  %v2052_v27 = vsel %vm4261_vm1, %v2050_v29, %v2048_v8 }
 0x53d   :  { %2298 = vmatmul.bf16.vlgmr.msra.gmra.mxu3 %v2190_v5  ;;  %v2051_v36 = vunpack.c.l.b16 %v2043_v37  ;;  %v2054_v28 = vpack.c.b16 %v2052_v27, %v2052_v27 }
 0x53e   :  { %2311 = vmatmul.bf16.vlgmr.msrb.gmra.mxu2 %v2191_v39 }
 0x53f   :  { %v2053_v18 = vsel %vm4262_vm8, %v2051_v36, %v2049_v45  ;;  %2162 = vmatmul.bf16.vlgmr.msra.gmra.mxu0 %v2054_v28 }
 0x540   :  { %v2055_v30 = vpack.c.b16 %v2053_v18, %v2053_v18 }
 0x542   :  { %2175 = vmatmul.bf16.vlgmr.msra.gmra.mxu1 %v2055_v30 }
 0x5bc   :  { %v2163_v21 = vpop.f32.mrf.mxu0 }
 0x5bf   :  { %v2176_v9 = vpop.f32.mrf.mxu1 }
 0x5c0   :  { %v2177_v38 = vadd.f32 %v2176_v9, %v2163_v21  ;;  %v2299_v6 = vpop.f32.mrf.mxu3 }
 0x5c1   :  { %v2312_v33 = vpop.f32.mrf.mxu2 }
 0x5c2   :  { %v2300_v52 = vadd.f32 %v2299_v6, %v2177_v38 }
 0x5c4   :  { %v2313_v26 = vadd.f32 %v2312_v33, %v2300_v52  ;;  %v2165_v50 = vpop.f32.mrf.mxu0 }
 0x5c6   :  { %v2317_v43 = vadd.f32 %v2316_v7, %v2313_v26 }
 0x5c7   :  { %v2178_v58 = vpop.f32.mrf.mxu1 }
 0x5c8   :  { %2934 = vtanh.f32 %v2317_v43  ;;  %v2301_v48 = vpop.f32.mrf.mxu3 }
 0x5c9   :  { %v2314_v46 = vpop.f32.mrf.mxu2 }
 0x5ce   :  { %v2935_v61 = vpop.eup %2934 }
 0x5cf   :  { %2319 = vst.msk [vmem:[#allocation5] sm:$0x3] %vm4263_vm2, %v2935_v61 }
 0x5d0   :  { %2330 = dma.vmem_to_hbm [thread:$0]  %s2326_s0, 32, %s2328_s9, [#allocation4]  }
 0x5d1   :  { %2987 = dma.done.wait [#allocation4], 32  }
 0x5d2   :  { %2988 = vsyncadd [#allocation4], 4294967264 }
 0x5d3   :  { %2335 = vsyncpa [#allocation3], 1 }
 0x5d4   :  { %2336 = vsyncpa [#allocation4], 1 }

</bundles_post_ra>
